<compile_context>
chip_gen: v7x
topology: tpu7x:2x2x1
jax: 0.10.0
libtpu: 0.0.40
codegen_flags: <defaults>
</compile_context>

<pallas_src>
import numpy as np
import jax
import jax.numpy as jnp
from jax.experimental import pallas as pl
from jax.experimental.pallas import tpu as pltpu


def _zscale_kernel(x_ref, c_ref, s_ref, o_ref):
    # x_ref: [TB, TF]; c_ref/s_ref: [1, TF] (broadcast over rows); o_ref: [TB, TF]
    x = x_ref[...].astype(jnp.float32)
    c = c_ref[...]
    s = s_ref[...]          # s is a precomputed reciprocal (1/scale), safe on dropped cols
    o_ref[...] = ((x - c) * s).astype(o_ref.dtype)


def _zscale_pallas(x, center_safe, inv_scale_safe, *, tb=512, tf=512):
    B, F = x.shape
    # Block shapes: multiple of (8, 128) when tiled, or full extent when small.
    TB = B if B <= tb else tb          # tb is a multiple of 8
    TF = F if F <= tf else tf          # tf is a multiple of 128
    grid = (pl.cdiv(F, TF), pl.cdiv(B, TB))   # F outer, B inner -> params stay resident
    return pl.pallas_call(
        _zscale_kernel,
        out_shape=jax.ShapeDtypeStruct((B, F), x.dtype),
        grid=grid,
        in_specs=[
            pl.BlockSpec((TB, TF), lambda j, i: (i, j)),   # x tile
            pl.BlockSpec((1, TF), lambda j, i: (0, j)),    # center (re-DMA only on new F tile)
            pl.BlockSpec((1, TF), lambda j, i: (0, j)),    # inv_scale
        ],
        out_specs=pl.BlockSpec((TB, TF), lambda j, i: (i, j)),
        compiler_params=pltpu.CompilerParams(
            dimension_semantics=("parallel", "parallel"),
            vmem_limit_bytes=32 * 1024 * 1024,   # > v5e 16 MiB default, safe on v7x
        ),
    )(x, center_safe, inv_scale_safe)


class ZScaleData:
    """JAX/Pallas port of the PyTorch ZScaleData module."""

    def __init__(self, center, scale, eps=1e-5, min_pallas_bytes=128 * 1024):
        center = np.asarray(center, dtype=np.float32)
        scale = np.asarray(scale, dtype=np.float32)
        assert isinstance(eps, float) and eps >= 0.0
        assert center.ndim == 1 and center.shape == scale.shape
        self.eps = eps
        self.num_features = int(center.shape[0])
        self.min_pallas_bytes = int(min_pallas_bytes)

        keep = scale > eps
        self.keep_idx = np.nonzero(keep)[0]
        self.output_size = int(self.keep_idx.size)

        # "Safe" full-width parameters: dropped columns get center=0, inv_scale=1
        # so the kernel never divides by ~0; those columns are sliced away after.
        safe_scale = np.where(keep, scale, 1.0).astype(np.float32)
        inv_scale = (1.0 / safe_scale).astype(np.float32)
        center_safe = np.where(keep, center, 0.0).astype(np.float32)

        self.center_safe = jnp.asarray(center_safe)[None, :]      # [1, F]
        self.inv_scale_safe = jnp.asarray(inv_scale)[None, :]     # [1, F]
        self.keep_idx_j = jnp.asarray(self.keep_idx, dtype=jnp.int32)

    def _drop_columns(self, out_full):
        if self.output_size == self.num_features:
            return out_full                       # nothing dropped -> no gather at all
        return out_full[:, self.keep_idx_j]       # static slice; fuses into consumer

    def __call__(self, x):
        B, F = x.shape
        assert F == self.num_features
        if self.output_size == 0:
            # All features dropped -> empty output, mirrors torch's x[:, mask].
            return jnp.zeros((B, 0), dtype=x.dtype)

        # Small-input fast path: launch/pipeline overhead dwarfs the arithmetic.
        if x.size * x.dtype.itemsize < self.min_pallas_bytes:
            out_full = ((x - self.center_safe) * self.inv_scale_safe).astype(x.dtype)
            return self._drop_columns(out_full)

        out_full = _zscale_pallas(x, self.center_safe, self.inv_scale_safe)
        return self._drop_columns(out_full)


if __name__ == "__main__":
    key = jax.random.PRNGKey(0)
    k_x, k_c, k_s, k_x2 = jax.random.split(key, 4)

    # Small but non-trivial: F is a multiple of 128 (lane-dense output tiles),
    # B spans two batch tiles so the grid / resident-param path is exercised.
    B, F = 1024, 384

    center = np.asarray(jax.random.normal(k_c, (F,), dtype=jnp.float32))
    scale = np.abs(np.asarray(jax.random.normal(k_s, (F,), dtype=jnp.float32))) + 0.1
    scale[::5] = 0.0  # drop every 5th feature -> exercises output_size logic

    module = ZScaleData(center, scale, eps=1e-5)

    x = jax.random.normal(k_x, (B, F), dtype=jnp.float32)
    out = jax.block_until_ready(module(x))      # Pallas path

    # Reference (mirrors the PyTorch forward).
    keep = scale > 1e-5
    ref_full = (np.asarray(x) - center) / np.where(keep, scale, 1.0)
    ref = ref_full[:, keep]

    assert out.shape == (B, module.output_size), (out.shape, module.output_size)
    np.testing.assert_allclose(np.asarray(out), ref, rtol=1e-5, atol=1e-6)

    # Also exercise the small-input fast path with the same module.
    x_small = jax.random.normal(k_x2, (2, F), dtype=jnp.float32)
    out_small = jax.block_until_ready(module(x_small))
    ref_small = ((np.asarray(x_small) - center) / np.where(keep, scale, 1.0))[:, keep]
    assert out_small.shape == (2, module.output_size)
    np.testing.assert_allclose(np.asarray(out_small), ref_small, rtol=1e-5, atol=1e-6)

    print("KERNEL_OK")
</pallas_src>

<mosaic_0001>
module attributes {stable_mosaic.version = 11 : i64} {
  func.func @_zscale_kernel(%arg0: i32, %arg1: i32, %arg2: memref<512x384xf32, #tpu.memory_space<vmem>>, %arg3: memref<1x384xf32, #tpu.memory_space<vmem>>, %arg4: memref<1x384xf32, #tpu.memory_space<vmem>>, %arg5: memref<512x384xf32, #tpu.memory_space<vmem>>) attributes {dimension_semantics = [#tpu.dimension_semantics<parallel>, #tpu.dimension_semantics<parallel>], iteration_bounds = array<i64: 1, 2>, scalar_prefetch = 0 : i64, scratch_operands = 0 : i64, tpu.core_type = #tpu.core_type<tc>, window_params = [{transform_indices = @transform_0, window_bounds = array<i64: 512, 384>}, {transform_indices = @transform_1, window_bounds = array<i64: 1, 384>}, {transform_indices = @transform_2, window_bounds = array<i64: 1, 384>}, {transform_indices = @transform_3, window_bounds = array<i64: 512, 384>}]} {
    %c0 = arith.constant 0 : index
    %c0_0 = arith.constant 0 : index
    %0 = vector.load %arg2[%c0, %c0_0] : memref<512x384xf32, #tpu.memory_space<vmem>>, vector<512x384xf32>
    %c0_1 = arith.constant 0 : index
    %c0_2 = arith.constant 0 : index
    %1 = vector.load %arg3[%c0_1, %c0_2] : memref<1x384xf32, #tpu.memory_space<vmem>>, vector<1x384xf32>
    %c0_3 = arith.constant 0 : index
    %c0_4 = arith.constant 0 : index
    %2 = vector.load %arg4[%c0_3, %c0_4] : memref<1x384xf32, #tpu.memory_space<vmem>>, vector<1x384xf32>
    %3 = vector.broadcast %1 : vector<1x384xf32> to vector<512x384xf32>
    %4 = arith.subf %0, %3 : vector<512x384xf32>
    %5 = vector.broadcast %2 : vector<1x384xf32> to vector<512x384xf32>
    %6 = arith.mulf %4, %5 : vector<512x384xf32>
    %c0_5 = arith.constant 0 : index
    %c0_6 = arith.constant 0 : index
    %7 = vector.load %arg5[%c0_5, %c0_6] : memref<512x384xf32, #tpu.memory_space<vmem>>, vector<512x384xf32>
    tpu.vector_store %arg5[%c0_5, %c0_6], %6 {strides = array<i32>} : memref<512x384xf32, #tpu.memory_space<vmem>>, vector<512x384xf32>,
    return
  }
  func.func @transform_0(%arg0: i32, %arg1: i32) -> (i32, i32) {
    %c0_i32 = arith.constant 0 : i32
    return %arg1, %arg0 : i32, i32
  }
  func.func @transform_1(%arg0: i32, %arg1: i32) -> (i32, i32) {
    %c0_i32 = arith.constant 0 : i32
    %c0_i32_0 = arith.constant 0 : i32
    return %c0_i32, %arg0 : i32, i32
  }
  func.func @transform_2(%arg0: i32, %arg1: i32) -> (i32, i32) {
    %c0_i32 = arith.constant 0 : i32
    %c0_i32_0 = arith.constant 0 : i32
    return %c0_i32, %arg0 : i32, i32
  }
  func.func @transform_3(%arg0: i32, %arg1: i32) -> (i32, i32) {
    %c0_i32 = arith.constant 0 : i32
    return %arg1, %arg0 : i32, i32
  }
}

</mosaic_0001>

<bundles_post_ra>
// kernel: tpu_custom_call.1
= control target key start
LH: loop header
LB: loop body
LE: loop exit
PB: predicated region body
PF: predicated region fallthrough
CT: control target
= control target key end

     0   :  { %8 = vsyncpa [#allocation3], 0  ;;  %s2532_s0 = inlined_call_operand.hbm [shape: f32[1024,384], index: 0, kind: input, shape index: {}]   ;;  %s2533_s1 = inlined_call_operand.hbm [shape: f32[1,384], index: 1, kind: input, shape index: {}]   ;;  %s2534_s2 = inlined_call_operand.hbm [shape: f32[1,384], index: 2, kind: input, shape index: {}]   ;;  %s2535_s3 = inlined_call_operand.hbm [shape: f32[1024,384], index: 3, kind: output, shape index: {}]  }
   0x1   :  { %10 = vsyncpa [#allocation3 + $0x1], 0 }
   0x2   :  { %11 = vsyncpa [#allocation6], 0 }
   0x3   :  { %12 = vsyncpa [#allocation4], 0 }
   0x4   :  { %14 = vsyncpa [#allocation4 + $0x1], 0  ;;  %s1494_s12 = smov 0   ;;  %s1496_s13 = smov 0  }
   0x5   :  { %s1498_s14 = smov 0   ;;  %s1500_s15 = smov 0  }
   0x6   :  { %s1502_s16 = smov 0   ;;  %s1504_s17 = smov 0  }
   0x7 LB: > { %s1184_s18 = sadd.s32 4294967295, %s1464_s17   ;;  %s1185_s19 = sadd.s32 4294967294, %s1464_s17   ;;  %s1464_s17 = sphi %s1504_s17, %s20_s17   ;;  %s1460_s16 = sphi %s1502_s16, %s2561_s16   ;;  %s1456_s15 = sphi %s1500_s15, %s2560_s15   ;;  %s1452_s14 = sphi %s1498_s14, %s2559_s14   ;;  %s1448_s13 = sphi %s1496_s13, %s2558_s13   ;;  %s1444_s12 = sphi %s1494_s12, %s2557_s12  }
   0x8   : > { %s41_s20 = sadd.s32 1, %s1452_s14  ;;  %p48_p0 = scmp.ne.s32.totalorder %s1452_s14, %s1448_s13 }
   0x9   : > { %p49_p1 = scmp.eq.s32.totalorder %s1464_s17, 0  ;;  %p54_p2 = scmp.ne.s32.totalorder %s1448_s13, %s1444_s12 }
   0xa   : > { %p1532_p3 = scmp.eq.s32.totalorder %s1184_s18, 0  ;;  %p132_p4 = scmp.eq.s32.totalorder %s1184_s18, 1 }
   0xb   : > { %p1536_p5 = por %p49_p1, %p48_p0  ;;  %p138_p6 = scmp.eq.s32.totalorder %s1185_s19, 1 }
   0xc   : > { %s2542_s21 = scalar_select %p1532_p3, 1, 0 }
   0xd   : > { %p1542_p7 = por %p1532_p3, %p54_p2  ;;  %p1546_p8 = por %p132_p4, %p48_p0 }
   0xe   : > { %p1550_p9 = por %p138_p6, %p54_p2  ;;  %p1186_p10 = scmp.ge.s32.totalorder %s1464_s17, 1 }
   0xf   : > { %s2544_s23 = scalar_select %p1542_p7, 1, 0 }
  0x10   : > { %s2545_s24 = scalar_select %p1546_p8, 1, 0 }
  0x11   : > { %s2546_s25 = scalar_select %p1550_p9, 1, 0 }
  0x12   : > { %p145_p11 = scmp.lt.s32.totalorder %s1464_s17, 3  ;;  %s1466_s27 = smov [#allocation5]  }
  0x13   : > { %s161_s28 = sshll.u32 %s1466_s27, 4  ;;  %p1234_p1 = scmp.lt.s32.totalorder %s1464_s17, 2  ;;  %s162_s28 = int_to_ptr.vmem [resolvable:$true] %s161_s28 }
  0x14   : > { %p1557_p13 = pnand %p1186_p10, %p145_p11  ;;  %s1467_s30 = smov [#allocation7]  }
  0x15   : > { %p1566_p4 = pnand %p1234_p1, %p1536_p5  ;;  %s175_s4 = sshll.u32 %s1467_s30, 4  ;;  %s1576_s4 = int_to_ptr.vmem [resolvable:$true] %s175_s4 }
  0x16   : > { %s2547_s26 = scalar_select %p1557_p13, 1, 0 }
  0x17   : > { %p1217_p0 = pneg %p1557_p13  ;;  %s1292_s8 = scalar_lea.hbm %s2533_s1, 48 }
  0x18   : > { %s2548_s29 = scalar_select %p1566_p4, 1, 0 }
  0x19   : > { %p1572_p2 = pnand %p1217_p0, %p1532_p3  ;;  %p1293_p5 = scmp.ne.s32.totalorder %s2533_s1, %s1292_s8 }
  0x1a   : > { %p1299_p1 = scmp.lt.u32.totalorder %s1292_s8, %s2533_s1 }
  0x1b   : > { %p1294_p6 = pneg %p1572_p2 }
  0x1d   : > { %p1295_p10 = pnand %p1294_p6, %p1293_p5 }
  0x1f   : > { %p1296_p11 = pneg %p1295_p10 }
  0x21   : > { %p1301_p0 = pnand %p1299_p1, %p1296_p11 }
  0x23   : > { %1304 = shalt.err (!%p1301_p0)
}
  0x24   : > { %s1305_s19 = scalar_lea.vmem %s162_s28, 48  ;;  %s1312_s22 = scalar_lea.vmem %s162_s28, 64 }
  0x25   : > { %p1306_p12 = scmp.ne.s32.totalorder %s162_s28, %s1305_s19  ;;  %p1313_p3 = scmp.lt.s32.totalorder %s162_s28, %s162_s28 }
  0x26   : > { %p1314_p7 = scmp.lt.s32.totalorder %s1312_s22, %s1305_s19 }
  0x27   : > { %p1308_p9 = pnand %p1306_p12, %p1294_p6 }
  0x28   : > { %p1315_p13 = por %p1314_p7, %p1313_p3 }
  0x29   : > { %p1309_p8 = pneg %p1308_p9 }
  0x2b   : > { %p1316_p4 = pnand %p1315_p13, %p1309_p8 }
  0x2d   : > { %1319 = shalt.err (!%p1316_p4)
}
  0x2e   : > { %1220 = dma.hbm_to_vmem [thread:$0]  (!%p1572_p2), %s2533_s1, 48, %s162_s28, [#allocation6]  }
  0x2f   : > { %s1320_s8 = scalar_lea.hbm %s2534_s2, 48 }
  0x30   : > { %p1321_p9 = scmp.ne.s32.totalorder %s2534_s2, %s1320_s8  ;;  %p1327_p8 = scmp.lt.u32.totalorder %s1320_s8, %s2534_s2 }
  0x32   : > { %p1323_p3 = pnand %p1321_p9, %p1294_p6 }
  0x34   : > { %p1324_p7 = pneg %p1323_p3 }
  0x36   : > { %p1329_p12 = pnand %p1327_p8, %p1324_p7 }
  0x38   : > { %1332 = shalt.err (!%p1329_p12)
}
  0x39   : > { %s1333_s28 = scalar_lea.vmem %s1576_s4, 48  ;;  %s1340_s19 = scalar_lea.vmem %s1576_s4, 64 }
  0x3a   : > { %p1334_p13 = scmp.ne.s32.totalorder %s1576_s4, %s1333_s28  ;;  %p1341_p10 = scmp.lt.s32.totalorder %s1576_s4, %s1576_s4 }
  0x3b   : > { %p1342_p11 = scmp.lt.s32.totalorder %s1340_s19, %s1333_s28 }
  0x3c   : > { %p1336_p4 = pnand %p1334_p13, %p1294_p6 }
  0x3d   : > { %p1343_p1 = por %p1342_p11, %p1341_p10 }
  0x3e   : > { %p1337_p5 = pneg %p1336_p4 }
  0x40   : > { %p1344_p0 = pnand %p1343_p1, %p1337_p5 }
  0x42   : > { %1347 = shalt.err (!%p1344_p0)
}
  0x43   : > { %1223 = dma.hbm_to_vmem [thread:$0]  (!%p1572_p2), %s2534_s2, 48, %s1576_s4, [#allocation6]  }
  0x44   : > { %s29_s30 = sadd.s32 1, %s1460_s16  ;;  %s186_s6 = sand.u32 1, %s1452_s14  }
  0x45   : > { %p30_p6 = scmp.ge.s32.totalorder %s29_s30, 2  ;;  %s1201_s7 = smul.u32 1536, %s186_s6 }
  0x46   : > { %s1202_s5 = smul.u32 24576, %s1460_s16  ;;  %s1645_s19 = scalar_lea.sflag [#allocation3], %s186_s6 }
  0x47   : > { %s2563_s30 = smov (%p30_p6, %s29_s30), 0  ;;  %s190_s9 = scalar_lea.vmem [#allocation2], %s1201_s7 }
  0x48   : > { %s36_s8 = ssub.s32 %s1460_s16, %s2563_s30  ;;  %s200_s10 = sshll.u32 %s190_s9, 4  ;;  %s1638_s10 = int_to_ptr.vmem [resolvable:$true] %s200_s10 }
  0x49   : > { %p39_p9 = scmp.eq.s32.totalorder %s36_s8, 0  ;;  %s1636_s28 = scalar_lea.hbm %s2532_s0, %s1202_s5 }
  0x4a   : > { %s1348_s22 = scalar_lea.hbm %s1636_s28, 24576  ;;  %p2550_p3 = scmp.ne.s32.totalorder %s2548_s29, 0 }
  0x4b   : > { %s1643_s4 = scalar_select %p39_p9, %s1452_s14, %s41_s20  }
  0x4c   : > { %p1349_p2 = scmp.ne.s32.totalorder %s1636_s28, %s1348_s22  ;;  %p1350_p7 = pneg %p2550_p3 }
  0x4d   : > { %s1353_s5 = scalar_lea.hbm %s2532_s0, 49152  ;;  %p1354_p13 = scmp.lt.u32.totalorder %s1636_s28, %s2532_s0 }
  0x4e   : > { %p1351_p8 = pnand %p1350_p7, %p1349_p2  ;;  %p1355_p4 = scmp.lt.u32.totalorder %s1353_s5, %s1348_s22 }
  0x4f   : > { %p1357_p10 = scmp.lt.u32.totalorder %s1348_s22, %s1636_s28 }
  0x50   : > { %p1352_p12 = pneg %p1351_p8  ;;  %p1356_p5 = por %p1355_p4, %p1354_p13 }
  0x52   : > { %p1358_p11 = por %p1357_p10, %p1356_p5 }
  0x54   : > { %p1359_p1 = pnand %p1358_p11, %p1352_p12 }
  0x56   : > { %1362 = shalt.err (!%p1359_p1)
}
  0x57   : > { %s1363_s20 = scalar_lea.vmem %s1638_s10, 24576  ;;  %s1468_s6 = smov [#allocation2]  }
  0x58   : > { %p1364_p0 = scmp.ne.s32.totalorder %s1638_s10, %s1363_s20  ;;  %s1368_s11 = sshll.u32 %s1468_s6, 4  ;;  %s1369_s11 = int_to_ptr.vmem [resolvable:$false] %s1368_s11 }
  0x59   : > { %s1370_s18 = scalar_lea.vmem %s1369_s11, 49152  ;;  %p1371_p2 = scmp.lt.s32.totalorder %s1638_s10, %s1369_s11 }
  0x5a   : > { %p1366_p6 = pnand %p1364_p0, %p1350_p7  ;;  %p1372_p8 = scmp.lt.s32.totalorder %s1370_s18, %s1363_s20 }
  0x5c   : > { %p1367_p9 = pneg %p1366_p6  ;;  %p1373_p13 = por %p1372_p8, %p1371_p2 }
  0x5e   : > { %p1374_p4 = pnand %p1373_p13, %p1367_p9 }
  0x60   : > { %1377 = shalt.err (!%p1374_p4)
}
  0x61   : > { %s1469_s22 = smov 384   ;;  %s1470_s27 = smov 24  }
  0x62   : > { %1227 = dma.hbm_to_vmem [thread:$0]  (!%p2550_p3), %s1636_s28, 24576, %s1638_s10, %s1645_s19, %s1469_s22, %s1469_s22, %s1470_s27  }
  0x63   : > { %p2551_p7 = scmp.ne.s32.totalorder %s2547_s26, 0 }
  0x64   : > { %s1676_s7 = sand.u32 (!%p2551_p7), 1, %s1448_s13   ;;  %p2552_p12 = scmp.ne.s32.totalorder (!%p2551_p7), %s2544_s23, 0 }
  0x65   : > { %212 = sbr.rel (%p2551_p7) target bundleno = 256 (0x100), region = 32  ;;  %s215_s8 = scalar_lea.sflag (!%p2551_p7), [#allocation3], %s1676_s7 }
  0x66   : > { %s1203_s5 = smul.u32 (!%p2551_p7), 1536, %s1676_s7 }
  0x68   : > { %s1682_s9 = scalar_lea.vmem (!%p2551_p7), [#allocation2], %s1203_s5 }
  0x6c   : > { %1431 = dma.done.wait (%p2552_p12), %s215_s8, 24576  }
  0x6d   : > { %1433 = vsyncadd (%p2552_p12), %s215_s8, 4294942720  ;;  %p2553_p3 = scmp.ne.s32.totalorder %s2542_s21, 0 }
  0x6f   : > { %1435 = dma.done.wait (%p2553_p3), [#allocation6], 96  }
  0x70   : > { %1437 = vsyncadd (%p2553_p3), [#allocation6], 4294967200  ;;  %v450_v0 = vlaneseq  ;;  %v255_v5 = vld [vmem:[%s1682_s9] sm:$0xff]  ;;  %v256_v10 = vld [vmem:[%s1682_s9 + $0x8] sm:$0xff]  ;;  %s1738_s21 = scalar_lea.vmem [#allocation8], %s1203_s5  ;;  %s1204_s23 = smul.u32 24576, %s1456_s15 }
  0x71   : > { %v447_v6 = vld [vmem:[#allocation5] sm:$0x7]  ;;  %v448_v7 = vld [vmem:[#allocation7] sm:$0x7]  ;;  %v257_v13 = vld [vmem:[%s1682_s9 + $0x10] sm:$0xff]  ;;  %s1074_s26 = sshll.u32 %s1738_s21, 4  ;;  %s2466_s26 = int_to_ptr.vmem [resolvable:$true] %s1074_s26 }
  0x72   : > { %v451_v1 = vshrl.u32 %v450_v0, 7  ;;  %v258_v14 = vld [vmem:[%s1682_s9 + $0x18] sm:$0xff]  ;;  %v259_v17 = vld [vmem:[%s1682_s9 + $0x20] sm:$0xff]  ;;  %v260_v18 = vld [vmem:[%s1682_s9 + $0x28] sm:$0xff]  ;;  %s2475_s10 = scalar_lea.hbm %s2535_s3, %s1204_s23  ;;  %s1058_s28 = scalar_lea.sflag [#allocation4], %s1676_s7 }
  0x73   : > { %v261_v19 = vld [vmem:[%s1682_s9 + $0x30] sm:$0xff]  ;;  %v262_v24 = vld [vmem:[%s1682_s9 + $0x38] sm:$0xff]  ;;  %v263_v25 = vld [vmem:[%s1682_s9 + $0x40] sm:$0xff]  ;;  %s1378_s19 = scalar_lea.vmem %s2466_s26, 24576  ;;  %p2554_p10 = scmp.ne.s32.totalorder %s2545_s24, 0 }
  0x74   : > { %v452_v2 = vsub.s32 0, %v451_v1  ;;  %v456_v3 = vsub.s32 1, %v451_v1  ;;  %v460_v4 = vsub.s32 2, %v451_v1  ;;  %v264_v26 = vld [vmem:[%s1682_s9 + $0x48] sm:$0xff]  ;;  %v265_v31 = vld [vmem:[%s1682_s9 + $0x50] sm:$0xff]  ;;  %v266_v32 = vld [vmem:[%s1682_s9 + $0x58] sm:$0xff]  ;;  %p1379_p5 = scmp.ne.s32.totalorder %s2466_s26, %s1378_s19 }
  0x75   : > { %v267_v33 = vld [vmem:[%s1682_s9 + $0x60] sm:$0xff]  ;;  %v268_v38 = vld [vmem:[%s1682_s9 + $0x68] sm:$0xff]  ;;  %v269_v39 = vld [vmem:[%s1682_s9 + $0x70] sm:$0xff]  ;;  %s1471_s20 = smov [#allocation8]  }
  0x76   : > { %v1693_v8 = vrot.slane %v447_v6, %v452_v2  ;;  %v1695_v9 = vrot.slane %v448_v7, %v452_v2  ;;  %v1698_v11 = vrot.slane %v447_v6, %v456_v3  ;;  %v1700_v12 = vrot.slane %v448_v7, %v456_v3  ;;  %v270_v40 = vld [vmem:[%s1682_s9 + $0x78] sm:$0xff]  ;;  %v271_v49 = vld [vmem:[%s1682_s9 + $0x80] sm:$0xff]  ;;  %v272_v50 = vld [vmem:[%s1682_s9 + $0x88] sm:$0xff]  ;;  %p1380_p11 = pnand %p1379_p5, %p2554_p10  ;;  %s1382_s6 = sshll.u32 %s1471_s20, 4  ;;  %s1383_s6 = int_to_ptr.vmem [resolvable:$false] %s1382_s6 }
  0x77   : > { %v1704_v15 = vrot.slane %v447_v6, %v460_v4  ;;  %v1706_v16 = vrot.slane %v448_v7, %v460_v4  ;;  %v273_v55 = vld [vmem:[%s1682_s9 + $0x90] sm:$0xff]  ;;  %v274_v56 = vld [vmem:[%s1682_s9 + $0x98] sm:$0xff]  ;;  %v275_v57 = vld [vmem:[%s1682_s9 + $0xa0] sm:$0xff]  ;;  %s1384_s11 = scalar_lea.vmem %s1383_s6, 49152  ;;  %p1385_p0 = scmp.lt.s32.totalorder %s2466_s26, %s1383_s6 }
  0x78   : > { %v465_v20 = vsub.f32 %v255_v5, %v1693_v8  ;;  %v466_v21 = vsub.f32 %v256_v10, %v1698_v11  ;;  %v468_v22 = vsub.f32 %v258_v14, %v1693_v8  ;;  %v469_v23 = vsub.f32 %v259_v17, %v1698_v11  ;;  %v276_v62 = vld [vmem:[%s1682_s9 + $0xa8] sm:$0xff]  ;;  %v277_v63 = vld [vmem:[%s1682_s9 + $0xb0] sm:$0xff]  ;;  %v278_v0 = vld [vmem:[%s1682_s9 + $0xb8] sm:$0xff]  ;;  %p1381_p1 = pneg %p1380_p11  ;;  %p1386_p6 = scmp.lt.s32.totalorder %s1384_s11, %s1378_s19 }
  0x79   : > { %v467_v27 = vsub.f32 %v257_v13, %v1704_v15  ;;  %v470_v28 = vsub.f32 %v260_v18, %v1704_v15  ;;  %v471_v29 = vsub.f32 %v261_v19, %v1693_v8  ;;  %v472_v30 = vsub.f32 %v262_v24, %v1698_v11  ;;  %v279_v13 = vld [vmem:[%s1682_s9 + $0xc0] sm:$0xff]  ;;  %v280_v14 = vld [vmem:[%s1682_s9 + $0xc8] sm:$0xff] }
  0x7a   : > { %v673_v34 = vmul.f32 %v1695_v9, %v465_v20  ;;  %v674_v35 = vmul.f32 %v1700_v12, %v466_v21  ;;  %v676_v36 = vmul.f32 %v1695_v9, %v468_v22  ;;  %v677_v37 = vmul.f32 %v1700_v12, %v469_v23  ;;  %v281_v21 = vld [vmem:[%s1682_s9 + $0xd0] sm:$0xff]  ;;  %v282_v22 = vld [vmem:[%s1682_s9 + $0xd8] sm:$0xff]  ;;  %v283_v23 = vld [vmem:[%s1682_s9 + $0xe0] sm:$0xff]  ;;  %p1387_p9 = por %p1386_p6, %p1385_p0 }
  0x7b   : > { %v675_v41 = vmul.f32 %v1706_v16, %v467_v27  ;;  %v678_v42 = vmul.f32 %v1706_v16, %v470_v28  ;;  %v679_v43 = vmul.f32 %v1695_v9, %v471_v29  ;;  %v680_v44 = vmul.f32 %v1700_v12, %v472_v30  ;;  %v284_v28 = vld [vmem:[%s1682_s9 + $0xe8] sm:$0xff]  ;;  %v285_v29 = vld [vmem:[%s1682_s9 + $0xf0] sm:$0xff]  ;;  %v286_v30 = vld [vmem:[%s1682_s9 + $0xf8] sm:$0xff] }
  0x7c   : > { %865 = vst [vmem:[%s1738_s21] sm:$0xff] %v673_v34  ;;  %866 = vst [vmem:[%s1738_s21 + $0x8] sm:$0xff] %v674_v35  ;;  %v473_v45 = vsub.f32 %v263_v25, %v1704_v15  ;;  %v474_v46 = vsub.f32 %v264_v26, %v1693_v8  ;;  %v475_v47 = vsub.f32 %v265_v31, %v1698_v11  ;;  %p1388_p2 = pnand %p1387_p9, %p1381_p1 }
  0x7d   : > { %868 = vst [vmem:[%s1738_s21 + $0x18] sm:$0xff] %v676_v36  ;;  %869 = vst [vmem:[%s1738_s21 + $0x20] sm:$0xff] %v677_v37  ;;  %v476_v48 = vsub.f32 %v266_v32, %v1704_v15  ;;  %v477_v51 = vsub.f32 %v267_v33, %v1693_v8  ;;  %v478_v52 = vsub.f32 %v268_v38, %v1698_v11 }
  0x7e   : > { %867 = vst [vmem:[%s1738_s21 + $0x10] sm:$0xff] %v675_v41  ;;  %870 = vst [vmem:[%s1738_s21 + $0x28] sm:$0xff] %v678_v42  ;;  %v479_v53 = vsub.f32 %v269_v39, %v1704_v15  ;;  %v480_v54 = vsub.f32 %v270_v40, %v1693_v8  ;;  %v681_v58 = vmul.f32 %v1706_v16, %v473_v45  ;;  %v287_v39 = vld [vmem:[%s1682_s9 + $0x100] sm:$0xff]  ;;  %v288_v40 = vld [vmem:[%s1682_s9 + $0x108] sm:$0xff] }
  0x7f   : > { %871 = vst [vmem:[%s1738_s21 + $0x30] sm:$0xff] %v679_v43  ;;  %872 = vst [vmem:[%s1738_s21 + $0x38] sm:$0xff] %v680_v44  ;;  %v682_v59 = vmul.f32 %v1695_v9, %v474_v46  ;;  %v683_v60 = vmul.f32 %v1700_v12, %v475_v47  ;;  %v684_v61 = vmul.f32 %v1706_v16, %v476_v48  ;;  %v289_v45 = vld [vmem:[%s1682_s9 + $0x110] sm:$0xff]  ;;  %v290_v46 = vld [vmem:[%s1682_s9 + $0x118] sm:$0xff] }
  0x80   : > { %v685_v1 = vmul.f32 %v1695_v9, %v477_v51  ;;  %v686_v2 = vmul.f32 %v1700_v12, %v478_v52  ;;  %v687_v3 = vmul.f32 %v1706_v16, %v479_v53  ;;  %v688_v4 = vmul.f32 %v1695_v9, %v480_v54  ;;  %873 = vst [vmem:[%s1738_s21 + $0x40] sm:$0xff] %v681_v58  ;;  %v291_v47 = vld [vmem:[%s1682_s9 + $0x120] sm:$0xff]  ;;  %v292_v52 = vld [vmem:[%s1682_s9 + $0x128] sm:$0xff]  ;;  %v293_v53 = vld [vmem:[%s1682_s9 + $0x130] sm:$0xff] }
  0x81   : > { %874 = vst [vmem:[%s1738_s21 + $0x48] sm:$0xff] %v682_v59  ;;  %875 = vst [vmem:[%s1738_s21 + $0x50] sm:$0xff] %v683_v60  ;;  %v481_v5 = vsub.f32 %v271_v49, %v1698_v11  ;;  %v482_v6 = vsub.f32 %v272_v50, %v1704_v15  ;;  %v483_v7 = vsub.f32 %v273_v55, %v1693_v8  ;;  %v294_v54 = vld [vmem:[%s1682_s9 + $0x138] sm:$0xff] }
  0x82   : > { %876 = vst [vmem:[%s1738_s21 + $0x58] sm:$0xff] %v684_v61  ;;  %v484_v10 = vsub.f32 %v274_v56, %v1698_v11  ;;  %877 = vst [vmem:[%s1738_s21 + $0x60] sm:$0xff] %v685_v1  ;;  %v485_v17 = vsub.f32 %v275_v57, %v1704_v15  ;;  %v486_v18 = vsub.f32 %v276_v62, %v1693_v8 }
  0x83   : > { %878 = vst [vmem:[%s1738_s21 + $0x68] sm:$0xff] %v686_v2  ;;  %879 = vst [vmem:[%s1738_s21 + $0x70] sm:$0xff] %v687_v3  ;;  %v487_v19 = vsub.f32 %v277_v63, %v1698_v11  ;;  %v488_v20 = vsub.f32 %v278_v0, %v1704_v15  ;;  %v689_v24 = vmul.f32 %v1700_v12, %v481_v5  ;;  %v295_v63 = vld [vmem:[%s1682_s9 + $0x140] sm:$0xff]  ;;  %v296_v0 = vld [vmem:[%s1682_s9 + $0x148] sm:$0xff] }
  0x84   : > { %880 = vst [vmem:[%s1738_s21 + $0x78] sm:$0xff] %v688_v4  ;;  %v690_v25 = vmul.f32 %v1706_v16, %v482_v6  ;;  %v691_v26 = vmul.f32 %v1695_v9, %v483_v7  ;;  %v692_v27 = vmul.f32 %v1700_v12, %v484_v10  ;;  %v693_v31 = vmul.f32 %v1706_v16, %v485_v17  ;;  %v297_v5 = vld [vmem:[%s1682_s9 + $0x150] sm:$0xff]  ;;  %v298_v6 = vld [vmem:[%s1682_s9 + $0x158] sm:$0xff]  ;;  %v299_v7 = vld [vmem:[%s1682_s9 + $0x160] sm:$0xff] }
  0x85   : > { %v694_v32 = vmul.f32 %v1695_v9, %v486_v18  ;;  %v695_v33 = vmul.f32 %v1700_v12, %v487_v19  ;;  %v696_v34 = vmul.f32 %v1706_v16, %v488_v20  ;;  %881 = vst [vmem:[%s1738_s21 + $0x80] sm:$0xff] %v689_v24  ;;  %v489_v35 = vsub.f32 %v279_v13, %v1693_v8  ;;  %v300_v18 = vld [vmem:[%s1682_s9 + $0x168] sm:$0xff]  ;;  %v301_v19 = vld [vmem:[%s1682_s9 + $0x170] sm:$0xff]  ;;  %v302_v20 = vld [vmem:[%s1682_s9 + $0x178] sm:$0xff] }
  0x86   : > { %882 = vst [vmem:[%s1738_s21 + $0x88] sm:$0xff] %v690_v25  ;;  %883 = vst [vmem:[%s1738_s21 + $0x90] sm:$0xff] %v691_v26  ;;  %v490_v36 = vsub.f32 %v280_v14, %v1698_v11  ;;  %v491_v37 = vsub.f32 %v281_v21, %v1704_v15  ;;  %v492_v38 = vsub.f32 %v282_v22, %v1693_v8 }
  0x87   : > { %884 = vst [vmem:[%s1738_s21 + $0x98] sm:$0xff] %v692_v27  ;;  %885 = vst [vmem:[%s1738_s21 + $0xa0] sm:$0xff] %v693_v31  ;;  %v493_v41 = vsub.f32 %v283_v23, %v1698_v11  ;;  %v494_v42 = vsub.f32 %v284_v28, %v1704_v15  ;;  %v495_v43 = vsub.f32 %v285_v29, %v1693_v8  ;;  %v303_v29 = vld [vmem:[%s1682_s9 + $0x180] sm:$0xff] }
  0x88   : > { %886 = vst [vmem:[%s1738_s21 + $0xa8] sm:$0xff] %v694_v32  ;;  %887 = vst [vmem:[%s1738_s21 + $0xb0] sm:$0xff] %v695_v33  ;;  %v496_v44 = vsub.f32 %v286_v30, %v1698_v11  ;;  %v697_v48 = vmul.f32 %v1695_v9, %v489_v35  ;;  %v698_v49 = vmul.f32 %v1700_v12, %v490_v36  ;;  %v304_v30 = vld [vmem:[%s1682_s9 + $0x188] sm:$0xff]  ;;  %v305_v35 = vld [vmem:[%s1682_s9 + $0x190] sm:$0xff] }
  0x89   : > { %888 = vst [vmem:[%s1738_s21 + $0xb8] sm:$0xff] %v696_v34  ;;  %v699_v50 = vmul.f32 %v1706_v16, %v491_v37  ;;  %v700_v51 = vmul.f32 %v1695_v9, %v492_v38  ;;  %v701_v55 = vmul.f32 %v1700_v12, %v493_v41  ;;  %v702_v56 = vmul.f32 %v1706_v16, %v494_v42  ;;  %v306_v36 = vld [vmem:[%s1682_s9 + $0x198] sm:$0xff]  ;;  %v307_v37 = vld [vmem:[%s1682_s9 + $0x1a0] sm:$0xff]  ;;  %v308_v42 = vld [vmem:[%s1682_s9 + $0x1a8] sm:$0xff] }
  0x8a   : > { %v703_v57 = vmul.f32 %v1695_v9, %v495_v43  ;;  %v704_v58 = vmul.f32 %v1700_v12, %v496_v44  ;;  %889 = vst [vmem:[%s1738_s21 + $0xc0] sm:$0xff] %v697_v48  ;;  %890 = vst [vmem:[%s1738_s21 + $0xc8] sm:$0xff] %v698_v49  ;;  %v497_v59 = vsub.f32 %v287_v39, %v1704_v15  ;;  %v309_v43 = vld [vmem:[%s1682_s9 + $0x1b0] sm:$0xff]  ;;  %v310_v44 = vld [vmem:[%s1682_s9 + $0x1b8] sm:$0xff] }
  0x8b   : > { %891 = vst [vmem:[%s1738_s21 + $0xd0] sm:$0xff] %v699_v50  ;;  %892 = vst [vmem:[%s1738_s21 + $0xd8] sm:$0xff] %v700_v51  ;;  %v498_v60 = vsub.f32 %v288_v40, %v1693_v8  ;;  %v499_v61 = vsub.f32 %v289_v45, %v1698_v11  ;;  %v500_v62 = vsub.f32 %v290_v46, %v1704_v15 }
  0x8c   : > { %893 = vst [vmem:[%s1738_s21 + $0xe0] sm:$0xff] %v701_v55  ;;  %894 = vst [vmem:[%s1738_s21 + $0xe8] sm:$0xff] %v702_v56  ;;  %v501_v1 = vsub.f32 %v291_v47, %v1693_v8  ;;  %v502_v2 = vsub.f32 %v292_v52, %v1698_v11  ;;  %v503_v3 = vsub.f32 %v293_v53, %v1704_v15  ;;  %v311_v53 = vld [vmem:[%s1682_s9 + $0x1c0] sm:$0xff] }
  0x8d   : > { %895 = vst [vmem:[%s1738_s21 + $0xf0] sm:$0xff] %v703_v57  ;;  %896 = vst [vmem:[%s1738_s21 + $0xf8] sm:$0xff] %v704_v58  ;;  %v504_v4 = vsub.f32 %v294_v54, %v1693_v8  ;;  %v705_v10 = vmul.f32 %v1706_v16, %v497_v59  ;;  %v706_v13 = vmul.f32 %v1695_v9, %v498_v60  ;;  %v312_v54 = vld [vmem:[%s1682_s9 + $0x1c8] sm:$0xff]  ;;  %v313_v59 = vld [vmem:[%s1682_s9 + $0x1d0] sm:$0xff] }
  0x8e   : > { %v707_v14 = vmul.f32 %v1700_v12, %v499_v61  ;;  %v708_v17 = vmul.f32 %v1706_v16, %v500_v62  ;;  %v709_v21 = vmul.f32 %v1695_v9, %v501_v1  ;;  %v710_v22 = vmul.f32 %v1700_v12, %v502_v2  ;;  %v314_v60 = vld [vmem:[%s1682_s9 + $0x1d8] sm:$0xff]  ;;  %v315_v61 = vld [vmem:[%s1682_s9 + $0x1e0] sm:$0xff]  ;;  %v316_v2 = vld [vmem:[%s1682_s9 + $0x1e8] sm:$0xff] }
  0x8f   : > { %v711_v23 = vmul.f32 %v1706_v16, %v503_v3  ;;  %v712_v24 = vmul.f32 %v1695_v9, %v504_v4  ;;  %897 = vst [vmem:[%s1738_s21 + $0x100] sm:$0xff] %v705_v10  ;;  %898 = vst [vmem:[%s1738_s21 + $0x108] sm:$0xff] %v706_v13  ;;  %v505_v25 = vsub.f32 %v295_v63, %v1698_v11  ;;  %v317_v3 = vld [vmem:[%s1682_s9 + $0x1f0] sm:$0xff]  ;;  %v318_v4 = vld [vmem:[%s1682_s9 + $0x1f8] sm:$0xff] }
  0x90   : > { %899 = vst [vmem:[%s1738_s21 + $0x110] sm:$0xff] %v707_v14  ;;  %900 = vst [vmem:[%s1738_s21 + $0x118] sm:$0xff] %v708_v17  ;;  %v506_v26 = vsub.f32 %v296_v0, %v1704_v15  ;;  %v507_v27 = vsub.f32 %v297_v5, %v1693_v8  ;;  %v508_v28 = vsub.f32 %v298_v6, %v1698_v11 }
  0x91   : > { %901 = vst [vmem:[%s1738_s21 + $0x120] sm:$0xff] %v709_v21  ;;  %902 = vst [vmem:[%s1738_s21 + $0x128] sm:$0xff] %v710_v22  ;;  %v509_v31 = vsub.f32 %v299_v7, %v1704_v15  ;;  %v510_v32 = vsub.f32 %v300_v18, %v1693_v8  ;;  %v511_v33 = vsub.f32 %v301_v19, %v1698_v11  ;;  %v319_v19 = vld [vmem:[%s1682_s9 + $0x200] sm:$0xff] }
  0x92   : > { %903 = vst [vmem:[%s1738_s21 + $0x130] sm:$0xff] %v711_v23  ;;  %904 = vst [vmem:[%s1738_s21 + $0x138] sm:$0xff] %v712_v24  ;;  %v512_v34 = vsub.f32 %v302_v20, %v1704_v15  ;;  %v713_v38 = vmul.f32 %v1700_v12, %v505_v25  ;;  %v714_v39 = vmul.f32 %v1706_v16, %v506_v26  ;;  %v320_v20 = vld [vmem:[%s1682_s9 + $0x208] sm:$0xff]  ;;  %v321_v25 = vld [vmem:[%s1682_s9 + $0x210] sm:$0xff] }
  0x93   : > { %v715_v40 = vmul.f32 %v1695_v9, %v507_v27  ;;  %v716_v41 = vmul.f32 %v1700_v12, %v508_v28  ;;  %v717_v45 = vmul.f32 %v1706_v16, %v509_v31  ;;  %v718_v46 = vmul.f32 %v1695_v9, %v510_v32  ;;  %v322_v26 = vld [vmem:[%s1682_s9 + $0x218] sm:$0xff]  ;;  %v323_v27 = vld [vmem:[%s1682_s9 + $0x220] sm:$0xff]  ;;  %v324_v32 = vld [vmem:[%s1682_s9 + $0x228] sm:$0xff] }
  0x94   : > { %v719_v47 = vmul.f32 %v1700_v12, %v511_v33  ;;  %v720_v48 = vmul.f32 %v1706_v16, %v512_v34  ;;  %905 = vst [vmem:[%s1738_s21 + $0x140] sm:$0xff] %v713_v38  ;;  %906 = vst [vmem:[%s1738_s21 + $0x148] sm:$0xff] %v714_v39  ;;  %v513_v49 = vsub.f32 %v303_v29, %v1693_v8  ;;  %v325_v33 = vld [vmem:[%s1682_s9 + $0x230] sm:$0xff]  ;;  %v326_v34 = vld [vmem:[%s1682_s9 + $0x238] sm:$0xff] }
  0x95   : > { %907 = vst [vmem:[%s1738_s21 + $0x150] sm:$0xff] %v715_v40  ;;  %908 = vst [vmem:[%s1738_s21 + $0x158] sm:$0xff] %v716_v41  ;;  %v514_v50 = vsub.f32 %v304_v30, %v1698_v11  ;;  %v515_v51 = vsub.f32 %v305_v35, %v1704_v15  ;;  %v516_v52 = vsub.f32 %v306_v36, %v1693_v8 }
  0x96   : > { %909 = vst [vmem:[%s1738_s21 + $0x160] sm:$0xff] %v717_v45  ;;  %910 = vst [vmem:[%s1738_s21 + $0x168] sm:$0xff] %v718_v46  ;;  %v517_v55 = vsub.f32 %v307_v37, %v1698_v11  ;;  %v518_v56 = vsub.f32 %v308_v42, %v1704_v15  ;;  %v519_v57 = vsub.f32 %v309_v43, %v1693_v8  ;;  %v327_v43 = vld [vmem:[%s1682_s9 + $0x240] sm:$0xff] }
  0x97   : > { %911 = vst [vmem:[%s1738_s21 + $0x170] sm:$0xff] %v719_v47  ;;  %912 = vst [vmem:[%s1738_s21 + $0x178] sm:$0xff] %v720_v48  ;;  %v520_v58 = vsub.f32 %v310_v44, %v1698_v11  ;;  %v721_v62 = vmul.f32 %v1695_v9, %v513_v49  ;;  %v722_v63 = vmul.f32 %v1700_v12, %v514_v50  ;;  %v328_v44 = vld [vmem:[%s1682_s9 + $0x248] sm:$0xff]  ;;  %v329_v49 = vld [vmem:[%s1682_s9 + $0x250] sm:$0xff] }
  0x98   : > { %v723_v0 = vmul.f32 %v1706_v16, %v515_v51  ;;  %v724_v1 = vmul.f32 %v1695_v9, %v516_v52  ;;  %v725_v5 = vmul.f32 %v1700_v12, %v517_v55  ;;  %v726_v6 = vmul.f32 %v1706_v16, %v518_v56  ;;  %v330_v50 = vld [vmem:[%s1682_s9 + $0x258] sm:$0xff]  ;;  %v331_v51 = vld [vmem:[%s1682_s9 + $0x260] sm:$0xff]  ;;  %v332_v56 = vld [vmem:[%s1682_s9 + $0x268] sm:$0xff] }
  0x99   : > { %v727_v7 = vmul.f32 %v1695_v9, %v519_v57  ;;  %v728_v10 = vmul.f32 %v1700_v12, %v520_v58  ;;  %913 = vst [vmem:[%s1738_s21 + $0x180] sm:$0xff] %v721_v62  ;;  %914 = vst [vmem:[%s1738_s21 + $0x188] sm:$0xff] %v722_v63  ;;  %v521_v13 = vsub.f32 %v311_v53, %v1704_v15  ;;  %v333_v57 = vld [vmem:[%s1682_s9 + $0x270] sm:$0xff]  ;;  %v334_v58 = vld [vmem:[%s1682_s9 + $0x278] sm:$0xff] }
  0x9a   : > { %915 = vst [vmem:[%s1738_s21 + $0x190] sm:$0xff] %v723_v0  ;;  %916 = vst [vmem:[%s1738_s21 + $0x198] sm:$0xff] %v724_v1  ;;  %v522_v14 = vsub.f32 %v312_v54, %v1693_v8  ;;  %v523_v17 = vsub.f32 %v313_v59, %v1698_v11  ;;  %v524_v18 = vsub.f32 %v314_v60, %v1704_v15 }
  0x9b   : > { %917 = vst [vmem:[%s1738_s21 + $0x1a0] sm:$0xff] %v725_v5  ;;  %918 = vst [vmem:[%s1738_s21 + $0x1a8] sm:$0xff] %v726_v6  ;;  %v525_v21 = vsub.f32 %v315_v61, %v1693_v8  ;;  %v526_v22 = vsub.f32 %v316_v2, %v1698_v11  ;;  %v527_v23 = vsub.f32 %v317_v3, %v1704_v15  ;;  %v335_v3 = vld [vmem:[%s1682_s9 + $0x280] sm:$0xff] }
  0x9c   : > { %919 = vst [vmem:[%s1738_s21 + $0x1b0] sm:$0xff] %v727_v7  ;;  %920 = vst [vmem:[%s1738_s21 + $0x1b8] sm:$0xff] %v728_v10  ;;  %v528_v24 = vsub.f32 %v318_v4, %v1693_v8  ;;  %v729_v28 = vmul.f32 %v1706_v16, %v521_v13  ;;  %v730_v29 = vmul.f32 %v1695_v9, %v522_v14  ;;  %v336_v4 = vld [vmem:[%s1682_s9 + $0x288] sm:$0xff]  ;;  %v337_v13 = vld [vmem:[%s1682_s9 + $0x290] sm:$0xff] }
  0x9d   : > { %v731_v30 = vmul.f32 %v1700_v12, %v523_v17  ;;  %v732_v31 = vmul.f32 %v1706_v16, %v524_v18  ;;  %v733_v35 = vmul.f32 %v1695_v9, %v525_v21  ;;  %v734_v36 = vmul.f32 %v1700_v12, %v526_v22  ;;  %v338_v14 = vld [vmem:[%s1682_s9 + $0x298] sm:$0xff]  ;;  %v339_v17 = vld [vmem:[%s1682_s9 + $0x2a0] sm:$0xff]  ;;  %v340_v22 = vld [vmem:[%s1682_s9 + $0x2a8] sm:$0xff] }
  0x9e   : > { %v735_v37 = vmul.f32 %v1706_v16, %v527_v23  ;;  %v736_v38 = vmul.f32 %v1695_v9, %v528_v24  ;;  %921 = vst [vmem:[%s1738_s21 + $0x1c0] sm:$0xff] %v729_v28  ;;  %922 = vst [vmem:[%s1738_s21 + $0x1c8] sm:$0xff] %v730_v29  ;;  %v529_v39 = vsub.f32 %v319_v19, %v1698_v11  ;;  %v341_v23 = vld [vmem:[%s1682_s9 + $0x2b0] sm:$0xff]  ;;  %v342_v24 = vld [vmem:[%s1682_s9 + $0x2b8] sm:$0xff] }
  0x9f   : > { %923 = vst [vmem:[%s1738_s21 + $0x1d0] sm:$0xff] %v731_v30  ;;  %924 = vst [vmem:[%s1738_s21 + $0x1d8] sm:$0xff] %v732_v31  ;;  %v530_v40 = vsub.f32 %v320_v20, %v1704_v15  ;;  %v531_v41 = vsub.f32 %v321_v25, %v1693_v8  ;;  %v532_v42 = vsub.f32 %v322_v26, %v1698_v11 }
  0xa0   : > { %925 = vst [vmem:[%s1738_s21 + $0x1e0] sm:$0xff] %v733_v35  ;;  %926 = vst [vmem:[%s1738_s21 + $0x1e8] sm:$0xff] %v734_v36  ;;  %v533_v45 = vsub.f32 %v323_v27, %v1704_v15  ;;  %v534_v46 = vsub.f32 %v324_v32, %v1693_v8  ;;  %v535_v47 = vsub.f32 %v325_v33, %v1698_v11  ;;  %v343_v33 = vld [vmem:[%s1682_s9 + $0x2c0] sm:$0xff] }
  0xa1   : > { %927 = vst [vmem:[%s1738_s21 + $0x1f0] sm:$0xff] %v735_v37  ;;  %928 = vst [vmem:[%s1738_s21 + $0x1f8] sm:$0xff] %v736_v38  ;;  %v536_v48 = vsub.f32 %v326_v34, %v1704_v15  ;;  %v737_v52 = vmul.f32 %v1700_v12, %v529_v39  ;;  %v738_v53 = vmul.f32 %v1706_v16, %v530_v40  ;;  %v344_v34 = vld [vmem:[%s1682_s9 + $0x2c8] sm:$0xff]  ;;  %v345_v39 = vld [vmem:[%s1682_s9 + $0x2d0] sm:$0xff] }
  0xa2   : > { %v739_v54 = vmul.f32 %v1695_v9, %v531_v41  ;;  %v740_v55 = vmul.f32 %v1700_v12, %v532_v42  ;;  %v741_v59 = vmul.f32 %v1706_v16, %v533_v45  ;;  %v742_v60 = vmul.f32 %v1695_v9, %v534_v46  ;;  %v346_v40 = vld [vmem:[%s1682_s9 + $0x2d8] sm:$0xff]  ;;  %v347_v41 = vld [vmem:[%s1682_s9 + $0x2e0] sm:$0xff]  ;;  %v348_v46 = vld [vmem:[%s1682_s9 + $0x2e8] sm:$0xff] }
  0xa3   : > { %v743_v61 = vmul.f32 %v1700_v12, %v535_v47  ;;  %v744_v62 = vmul.f32 %v1706_v16, %v536_v48  ;;  %929 = vst [vmem:[%s1738_s21 + $0x200] sm:$0xff] %v737_v52  ;;  %930 = vst [vmem:[%s1738_s21 + $0x208] sm:$0xff] %v738_v53  ;;  %v537_v63 = vsub.f32 %v327_v43, %v1693_v8  ;;  %v349_v47 = vld [vmem:[%s1682_s9 + $0x2f0] sm:$0xff]  ;;  %v350_v48 = vld [vmem:[%s1682_s9 + $0x2f8] sm:$0xff] }
  0xa4   : > { %931 = vst [vmem:[%s1738_s21 + $0x210] sm:$0xff] %v739_v54  ;;  %932 = vst [vmem:[%s1738_s21 + $0x218] sm:$0xff] %v740_v55  ;;  %v538_v0 = vsub.f32 %v328_v44, %v1698_v11  ;;  %v539_v1 = vsub.f32 %v329_v49, %v1704_v15  ;;  %v540_v2 = vsub.f32 %v330_v50, %v1693_v8 }
  0xa5   : > { %933 = vst [vmem:[%s1738_s21 + $0x220] sm:$0xff] %v741_v59  ;;  %934 = vst [vmem:[%s1738_s21 + $0x228] sm:$0xff] %v742_v60  ;;  %v541_v5 = vsub.f32 %v331_v51, %v1698_v11  ;;  %v542_v6 = vsub.f32 %v332_v56, %v1704_v15  ;;  %v543_v7 = vsub.f32 %v333_v57, %v1693_v8  ;;  %v351_v57 = vld [vmem:[%s1682_s9 + $0x300] sm:$0xff] }
  0xa6   : > { %935 = vst [vmem:[%s1738_s21 + $0x230] sm:$0xff] %v743_v61  ;;  %936 = vst [vmem:[%s1738_s21 + $0x238] sm:$0xff] %v744_v62  ;;  %v544_v10 = vsub.f32 %v334_v58, %v1698_v11  ;;  %v745_v18 = vmul.f32 %v1695_v9, %v537_v63  ;;  %v746_v19 = vmul.f32 %v1700_v12, %v538_v0  ;;  %v352_v58 = vld [vmem:[%s1682_s9 + $0x308] sm:$0xff]  ;;  %v353_v63 = vld [vmem:[%s1682_s9 + $0x310] sm:$0xff] }
  0xa7   : > { %v747_v20 = vmul.f32 %v1706_v16, %v539_v1  ;;  %v748_v21 = vmul.f32 %v1695_v9, %v540_v2  ;;  %v749_v25 = vmul.f32 %v1700_v12, %v541_v5  ;;  %v750_v26 = vmul.f32 %v1706_v16, %v542_v6  ;;  %v354_v0 = vld [vmem:[%s1682_s9 + $0x318] sm:$0xff]  ;;  %v355_v1 = vld [vmem:[%s1682_s9 + $0x320] sm:$0xff]  ;;  %v356_v6 = vld [vmem:[%s1682_s9 + $0x328] sm:$0xff] }
  0xa8   : > { %v751_v27 = vmul.f32 %v1695_v9, %v543_v7  ;;  %v752_v28 = vmul.f32 %v1700_v12, %v544_v10  ;;  %937 = vst [vmem:[%s1738_s21 + $0x240] sm:$0xff] %v745_v18  ;;  %938 = vst [vmem:[%s1738_s21 + $0x248] sm:$0xff] %v746_v19  ;;  %v545_v29 = vsub.f32 %v335_v3, %v1704_v15  ;;  %v357_v7 = vld [vmem:[%s1682_s9 + $0x330] sm:$0xff]  ;;  %v358_v10 = vld [vmem:[%s1682_s9 + $0x338] sm:$0xff] }
  0xa9   : > { %939 = vst [vmem:[%s1738_s21 + $0x250] sm:$0xff] %v747_v20  ;;  %940 = vst [vmem:[%s1738_s21 + $0x258] sm:$0xff] %v748_v21  ;;  %v546_v30 = vsub.f32 %v336_v4, %v1693_v8  ;;  %v547_v31 = vsub.f32 %v337_v13, %v1698_v11  ;;  %v548_v32 = vsub.f32 %v338_v14, %v1704_v15 }
  0xaa   : > { %941 = vst [vmem:[%s1738_s21 + $0x260] sm:$0xff] %v749_v25  ;;  %942 = vst [vmem:[%s1738_s21 + $0x268] sm:$0xff] %v750_v26  ;;  %v549_v35 = vsub.f32 %v339_v17, %v1693_v8  ;;  %v550_v36 = vsub.f32 %v340_v22, %v1698_v11  ;;  %v551_v37 = vsub.f32 %v341_v23, %v1704_v15  ;;  %v359_v23 = vld [vmem:[%s1682_s9 + $0x340] sm:$0xff] }
  0xab   : > { %943 = vst [vmem:[%s1738_s21 + $0x270] sm:$0xff] %v751_v27  ;;  %944 = vst [vmem:[%s1738_s21 + $0x278] sm:$0xff] %v752_v28  ;;  %v552_v38 = vsub.f32 %v342_v24, %v1693_v8  ;;  %v753_v42 = vmul.f32 %v1706_v16, %v545_v29  ;;  %v754_v43 = vmul.f32 %v1695_v9, %v546_v30  ;;  %v360_v24 = vld [vmem:[%s1682_s9 + $0x348] sm:$0xff]  ;;  %v361_v29 = vld [vmem:[%s1682_s9 + $0x350] sm:$0xff] }
  0xac   : > { %v755_v44 = vmul.f32 %v1700_v12, %v547_v31  ;;  %v756_v45 = vmul.f32 %v1706_v16, %v548_v32  ;;  %v757_v49 = vmul.f32 %v1695_v9, %v549_v35  ;;  %v758_v50 = vmul.f32 %v1700_v12, %v550_v36  ;;  %v362_v30 = vld [vmem:[%s1682_s9 + $0x358] sm:$0xff]  ;;  %v363_v31 = vld [vmem:[%s1682_s9 + $0x360] sm:$0xff]  ;;  %v364_v36 = vld [vmem:[%s1682_s9 + $0x368] sm:$0xff] }
  0xad   : > { %v759_v51 = vmul.f32 %v1706_v16, %v551_v37  ;;  %v760_v52 = vmul.f32 %v1695_v9, %v552_v38  ;;  %945 = vst [vmem:[%s1738_s21 + $0x280] sm:$0xff] %v753_v42  ;;  %946 = vst [vmem:[%s1738_s21 + $0x288] sm:$0xff] %v754_v43  ;;  %v553_v53 = vsub.f32 %v343_v33, %v1698_v11  ;;  %v365_v37 = vld [vmem:[%s1682_s9 + $0x370] sm:$0xff]  ;;  %v366_v38 = vld [vmem:[%s1682_s9 + $0x378] sm:$0xff] }
  0xae   : > { %947 = vst [vmem:[%s1738_s21 + $0x290] sm:$0xff] %v755_v44  ;;  %948 = vst [vmem:[%s1738_s21 + $0x298] sm:$0xff] %v756_v45  ;;  %v554_v54 = vsub.f32 %v344_v34, %v1704_v15  ;;  %v555_v55 = vsub.f32 %v345_v39, %v1693_v8  ;;  %v556_v56 = vsub.f32 %v346_v40, %v1698_v11 }
  0xaf   : > { %949 = vst [vmem:[%s1738_s21 + $0x2a0] sm:$0xff] %v757_v49  ;;  %950 = vst [vmem:[%s1738_s21 + $0x2a8] sm:$0xff] %v758_v50  ;;  %v557_v59 = vsub.f32 %v347_v41, %v1704_v15  ;;  %v558_v60 = vsub.f32 %v348_v46, %v1693_v8  ;;  %v559_v61 = vsub.f32 %v349_v47, %v1698_v11  ;;  %v367_v47 = vld [vmem:[%s1682_s9 + $0x380] sm:$0xff] }
  0xb0   : > { %951 = vst [vmem:[%s1738_s21 + $0x2b0] sm:$0xff] %v759_v51  ;;  %952 = vst [vmem:[%s1738_s21 + $0x2b8] sm:$0xff] %v760_v52  ;;  %v560_v62 = vsub.f32 %v350_v48, %v1704_v15  ;;  %v761_v2 = vmul.f32 %v1700_v12, %v553_v53  ;;  %v762_v3 = vmul.f32 %v1706_v16, %v554_v54  ;;  %v368_v48 = vld [vmem:[%s1682_s9 + $0x388] sm:$0xff]  ;;  %v369_v53 = vld [vmem:[%s1682_s9 + $0x390] sm:$0xff] }
  0xb1   : > { %v763_v4 = vmul.f32 %v1695_v9, %v555_v55  ;;  %v764_v5 = vmul.f32 %v1700_v12, %v556_v56  ;;  %v765_v13 = vmul.f32 %v1706_v16, %v557_v59  ;;  %v766_v14 = vmul.f32 %v1695_v9, %v558_v60  ;;  %v370_v54 = vld [vmem:[%s1682_s9 + $0x398] sm:$0xff]  ;;  %v371_v55 = vld [vmem:[%s1682_s9 + $0x3a0] sm:$0xff]  ;;  %v372_v60 = vld [vmem:[%s1682_s9 + $0x3a8] sm:$0xff] }
  0xb2   : > { %v767_v17 = vmul.f32 %v1700_v12, %v559_v61  ;;  %v768_v18 = vmul.f32 %v1706_v16, %v560_v62  ;;  %953 = vst [vmem:[%s1738_s21 + $0x2c0] sm:$0xff] %v761_v2  ;;  %954 = vst [vmem:[%s1738_s21 + $0x2c8] sm:$0xff] %v762_v3  ;;  %v561_v19 = vsub.f32 %v351_v57, %v1693_v8  ;;  %v373_v61 = vld [vmem:[%s1682_s9 + $0x3b0] sm:$0xff]  ;;  %v374_v62 = vld [vmem:[%s1682_s9 + $0x3b8] sm:$0xff] }
  0xb3   : > { %955 = vst [vmem:[%s1738_s21 + $0x2d0] sm:$0xff] %v763_v4  ;;  %956 = vst [vmem:[%s1738_s21 + $0x2d8] sm:$0xff] %v764_v5  ;;  %v562_v20 = vsub.f32 %v352_v58, %v1698_v11  ;;  %v563_v21 = vsub.f32 %v353_v63, %v1704_v15  ;;  %v564_v22 = vsub.f32 %v354_v0, %v1693_v8 }
  0xb4   : > { %957 = vst [vmem:[%s1738_s21 + $0x2e0] sm:$0xff] %v765_v13  ;;  %958 = vst [vmem:[%s1738_s21 + $0x2e8] sm:$0xff] %v766_v14  ;;  %v565_v25 = vsub.f32 %v355_v1, %v1698_v11  ;;  %v566_v26 = vsub.f32 %v356_v6, %v1704_v15  ;;  %v567_v27 = vsub.f32 %v357_v7, %v1693_v8  ;;  %v375_v7 = vld [vmem:[%s1682_s9 + $0x3c0] sm:$0xff] }
  0xb5   : > { %959 = vst [vmem:[%s1738_s21 + $0x2f0] sm:$0xff] %v767_v17  ;;  %960 = vst [vmem:[%s1738_s21 + $0x2f8] sm:$0xff] %v768_v18  ;;  %v568_v28 = vsub.f32 %v358_v10, %v1698_v11  ;;  %v769_v32 = vmul.f32 %v1695_v9, %v561_v19  ;;  %v770_v33 = vmul.f32 %v1700_v12, %v562_v20  ;;  %v376_v10 = vld [vmem:[%s1682_s9 + $0x3c8] sm:$0xff]  ;;  %v377_v19 = vld [vmem:[%s1682_s9 + $0x3d0] sm:$0xff] }
  0xb6   : > { %v771_v34 = vmul.f32 %v1706_v16, %v563_v21  ;;  %v772_v35 = vmul.f32 %v1695_v9, %v564_v22  ;;  %v773_v39 = vmul.f32 %v1700_v12, %v565_v25  ;;  %v774_v40 = vmul.f32 %v1706_v16, %v566_v26  ;;  %v378_v20 = vld [vmem:[%s1682_s9 + $0x3d8] sm:$0xff]  ;;  %v379_v21 = vld [vmem:[%s1682_s9 + $0x3e0] sm:$0xff]  ;;  %v380_v26 = vld [vmem:[%s1682_s9 + $0x3e8] sm:$0xff] }
  0xb7   : > { %v775_v41 = vmul.f32 %v1695_v9, %v567_v27  ;;  %v776_v42 = vmul.f32 %v1700_v12, %v568_v28  ;;  %961 = vst [vmem:[%s1738_s21 + $0x300] sm:$0xff] %v769_v32  ;;  %962 = vst [vmem:[%s1738_s21 + $0x308] sm:$0xff] %v770_v33  ;;  %v569_v43 = vsub.f32 %v359_v23, %v1704_v15  ;;  %v381_v27 = vld [vmem:[%s1682_s9 + $0x3f0] sm:$0xff]  ;;  %v382_v28 = vld [vmem:[%s1682_s9 + $0x3f8] sm:$0xff] }
  0xb8   : > { %963 = vst [vmem:[%s1738_s21 + $0x310] sm:$0xff] %v771_v34  ;;  %964 = vst [vmem:[%s1738_s21 + $0x318] sm:$0xff] %v772_v35  ;;  %v570_v44 = vsub.f32 %v360_v24, %v1693_v8  ;;  %v571_v45 = vsub.f32 %v361_v29, %v1698_v11  ;;  %v572_v46 = vsub.f32 %v362_v30, %v1704_v15 }
  0xb9   : > { %965 = vst [vmem:[%s1738_s21 + $0x320] sm:$0xff] %v773_v39  ;;  %966 = vst [vmem:[%s1738_s21 + $0x328] sm:$0xff] %v774_v40  ;;  %v573_v49 = vsub.f32 %v363_v31, %v1693_v8  ;;  %v574_v50 = vsub.f32 %v364_v36, %v1698_v11  ;;  %v575_v51 = vsub.f32 %v365_v37, %v1704_v15  ;;  %v383_v37 = vld [vmem:[%s1682_s9 + $0x400] sm:$0xff] }
  0xba   : > { %967 = vst [vmem:[%s1738_s21 + $0x330] sm:$0xff] %v775_v41  ;;  %968 = vst [vmem:[%s1738_s21 + $0x338] sm:$0xff] %v776_v42  ;;  %v576_v52 = vsub.f32 %v366_v38, %v1693_v8  ;;  %v777_v56 = vmul.f32 %v1706_v16, %v569_v43  ;;  %v778_v57 = vmul.f32 %v1695_v9, %v570_v44  ;;  %v384_v38 = vld [vmem:[%s1682_s9 + $0x408] sm:$0xff]  ;;  %v385_v43 = vld [vmem:[%s1682_s9 + $0x410] sm:$0xff] }
  0xbb   : > { %v779_v58 = vmul.f32 %v1700_v12, %v571_v45  ;;  %v780_v59 = vmul.f32 %v1706_v16, %v572_v46  ;;  %v781_v63 = vmul.f32 %v1695_v9, %v573_v49  ;;  %v782_v0 = vmul.f32 %v1700_v12, %v574_v50  ;;  %v386_v44 = vld [vmem:[%s1682_s9 + $0x418] sm:$0xff]  ;;  %v387_v45 = vld [vmem:[%s1682_s9 + $0x420] sm:$0xff]  ;;  %v388_v50 = vld [vmem:[%s1682_s9 + $0x428] sm:$0xff] }
  0xbc   : > { %v783_v1 = vmul.f32 %v1706_v16, %v575_v51  ;;  %v784_v2 = vmul.f32 %v1695_v9, %v576_v52  ;;  %969 = vst [vmem:[%s1738_s21 + $0x340] sm:$0xff] %v777_v56  ;;  %970 = vst [vmem:[%s1738_s21 + $0x348] sm:$0xff] %v778_v57  ;;  %v577_v3 = vsub.f32 %v367_v47, %v1698_v11  ;;  %v389_v51 = vld [vmem:[%s1682_s9 + $0x430] sm:$0xff]  ;;  %v390_v52 = vld [vmem:[%s1682_s9 + $0x438] sm:$0xff] }
  0xbd   : > { %971 = vst [vmem:[%s1738_s21 + $0x350] sm:$0xff] %v779_v58  ;;  %972 = vst [vmem:[%s1738_s21 + $0x358] sm:$0xff] %v780_v59  ;;  %v578_v4 = vsub.f32 %v368_v48, %v1704_v15  ;;  %v579_v5 = vsub.f32 %v369_v53, %v1693_v8  ;;  %v580_v6 = vsub.f32 %v370_v54, %v1698_v11 }
  0xbe   : > { %973 = vst [vmem:[%s1738_s21 + $0x360] sm:$0xff] %v781_v63  ;;  %974 = vst [vmem:[%s1738_s21 + $0x368] sm:$0xff] %v782_v0  ;;  %v581_v13 = vsub.f32 %v371_v55, %v1704_v15  ;;  %v582_v14 = vsub.f32 %v372_v60, %v1693_v8  ;;  %v583_v17 = vsub.f32 %v373_v61, %v1698_v11  ;;  %v391_v61 = vld [vmem:[%s1682_s9 + $0x440] sm:$0xff] }
  0xbf   : > { %975 = vst [vmem:[%s1738_s21 + $0x370] sm:$0xff] %v783_v1  ;;  %976 = vst [vmem:[%s1738_s21 + $0x378] sm:$0xff] %v784_v2  ;;  %v584_v18 = vsub.f32 %v374_v62, %v1704_v15  ;;  %v785_v22 = vmul.f32 %v1700_v12, %v577_v3  ;;  %v786_v23 = vmul.f32 %v1706_v16, %v578_v4  ;;  %v392_v62 = vld [vmem:[%s1682_s9 + $0x448] sm:$0xff]  ;;  %v393_v3 = vld [vmem:[%s1682_s9 + $0x450] sm:$0xff] }
  0xc0   : > { %v787_v24 = vmul.f32 %v1695_v9, %v579_v5  ;;  %v788_v25 = vmul.f32 %v1700_v12, %v580_v6  ;;  %v789_v29 = vmul.f32 %v1706_v16, %v581_v13  ;;  %v790_v30 = vmul.f32 %v1695_v9, %v582_v14  ;;  %v394_v4 = vld [vmem:[%s1682_s9 + $0x458] sm:$0xff]  ;;  %v395_v5 = vld [vmem:[%s1682_s9 + $0x460] sm:$0xff]  ;;  %v396_v14 = vld [vmem:[%s1682_s9 + $0x468] sm:$0xff] }
  0xc1   : > { %v791_v31 = vmul.f32 %v1700_v12, %v583_v17  ;;  %v792_v32 = vmul.f32 %v1706_v16, %v584_v18  ;;  %977 = vst [vmem:[%s1738_s21 + $0x380] sm:$0xff] %v785_v22  ;;  %978 = vst [vmem:[%s1738_s21 + $0x388] sm:$0xff] %v786_v23  ;;  %v585_v33 = vsub.f32 %v375_v7, %v1693_v8  ;;  %v397_v17 = vld [vmem:[%s1682_s9 + $0x470] sm:$0xff]  ;;  %v398_v18 = vld [vmem:[%s1682_s9 + $0x478] sm:$0xff] }
  0xc2   : > { %979 = vst [vmem:[%s1738_s21 + $0x390] sm:$0xff] %v787_v24  ;;  %980 = vst [vmem:[%s1738_s21 + $0x398] sm:$0xff] %v788_v25  ;;  %v586_v34 = vsub.f32 %v376_v10, %v1698_v11  ;;  %v587_v35 = vsub.f32 %v377_v19, %v1704_v15  ;;  %v588_v36 = vsub.f32 %v378_v20, %v1693_v8 }
  0xc3   : > { %981 = vst [vmem:[%s1738_s21 + $0x3a0] sm:$0xff] %v789_v29  ;;  %982 = vst [vmem:[%s1738_s21 + $0x3a8] sm:$0xff] %v790_v30  ;;  %v589_v39 = vsub.f32 %v379_v21, %v1698_v11  ;;  %v590_v40 = vsub.f32 %v380_v26, %v1704_v15  ;;  %v591_v41 = vsub.f32 %v381_v27, %v1693_v8  ;;  %v399_v27 = vld [vmem:[%s1682_s9 + $0x480] sm:$0xff] }
  0xc4   : > { %983 = vst [vmem:[%s1738_s21 + $0x3b0] sm:$0xff] %v791_v31  ;;  %984 = vst [vmem:[%s1738_s21 + $0x3b8] sm:$0xff] %v792_v32  ;;  %v592_v42 = vsub.f32 %v382_v28, %v1698_v11  ;;  %v793_v46 = vmul.f32 %v1695_v9, %v585_v33  ;;  %v794_v47 = vmul.f32 %v1700_v12, %v586_v34  ;;  %v400_v28 = vld [vmem:[%s1682_s9 + $0x488] sm:$0xff]  ;;  %v401_v33 = vld [vmem:[%s1682_s9 + $0x490] sm:$0xff] }
  0xc5   : > { %v795_v48 = vmul.f32 %v1706_v16, %v587_v35  ;;  %v796_v49 = vmul.f32 %v1695_v9, %v588_v36  ;;  %v797_v53 = vmul.f32 %v1700_v12, %v589_v39  ;;  %v798_v54 = vmul.f32 %v1706_v16, %v590_v40  ;;  %v402_v34 = vld [vmem:[%s1682_s9 + $0x498] sm:$0xff]  ;;  %v403_v35 = vld [vmem:[%s1682_s9 + $0x4a0] sm:$0xff]  ;;  %v404_v40 = vld [vmem:[%s1682_s9 + $0x4a8] sm:$0xff] }
  0xc6   : > { %v799_v55 = vmul.f32 %v1695_v9, %v591_v41  ;;  %v800_v56 = vmul.f32 %v1700_v12, %v592_v42  ;;  %985 = vst [vmem:[%s1738_s21 + $0x3c0] sm:$0xff] %v793_v46  ;;  %986 = vst [vmem:[%s1738_s21 + $0x3c8] sm:$0xff] %v794_v47  ;;  %v593_v57 = vsub.f32 %v383_v37, %v1704_v15  ;;  %v405_v41 = vld [vmem:[%s1682_s9 + $0x4b0] sm:$0xff]  ;;  %v406_v42 = vld [vmem:[%s1682_s9 + $0x4b8] sm:$0xff] }
  0xc7   : > { %987 = vst [vmem:[%s1738_s21 + $0x3d0] sm:$0xff] %v795_v48  ;;  %988 = vst [vmem:[%s1738_s21 + $0x3d8] sm:$0xff] %v796_v49  ;;  %v594_v58 = vsub.f32 %v384_v38, %v1693_v8  ;;  %v595_v59 = vsub.f32 %v385_v43, %v1698_v11  ;;  %v596_v60 = vsub.f32 %v386_v44, %v1704_v15 }
  0xc8   : > { %989 = vst [vmem:[%s1738_s21 + $0x3e0] sm:$0xff] %v797_v53  ;;  %990 = vst [vmem:[%s1738_s21 + $0x3e8] sm:$0xff] %v798_v54  ;;  %v597_v63 = vsub.f32 %v387_v45, %v1693_v8  ;;  %v598_v0 = vsub.f32 %v388_v50, %v1698_v11  ;;  %v599_v1 = vsub.f32 %v389_v51, %v1704_v15  ;;  %v407_v51 = vld [vmem:[%s1682_s9 + $0x4c0] sm:$0xff] }
  0xc9   : > { %991 = vst [vmem:[%s1738_s21 + $0x3f0] sm:$0xff] %v799_v55  ;;  %992 = vst [vmem:[%s1738_s21 + $0x3f8] sm:$0xff] %v800_v56  ;;  %v600_v2 = vsub.f32 %v390_v52, %v1693_v8  ;;  %v801_v6 = vmul.f32 %v1706_v16, %v593_v57  ;;  %v802_v7 = vmul.f32 %v1695_v9, %v594_v58  ;;  %v408_v52 = vld [vmem:[%s1682_s9 + $0x4c8] sm:$0xff]  ;;  %v409_v57 = vld [vmem:[%s1682_s9 + $0x4d0] sm:$0xff] }
  0xca   : > { %v803_v10 = vmul.f32 %v1700_v12, %v595_v59  ;;  %v804_v13 = vmul.f32 %v1706_v16, %v596_v60  ;;  %v805_v19 = vmul.f32 %v1695_v9, %v597_v63  ;;  %v806_v20 = vmul.f32 %v1700_v12, %v598_v0  ;;  %v410_v58 = vld [vmem:[%s1682_s9 + $0x4d8] sm:$0xff]  ;;  %v411_v59 = vld [vmem:[%s1682_s9 + $0x4e0] sm:$0xff]  ;;  %v412_v0 = vld [vmem:[%s1682_s9 + $0x4e8] sm:$0xff] }
  0xcb   : > { %v807_v21 = vmul.f32 %v1706_v16, %v599_v1  ;;  %v808_v22 = vmul.f32 %v1695_v9, %v600_v2  ;;  %993 = vst [vmem:[%s1738_s21 + $0x400] sm:$0xff] %v801_v6  ;;  %994 = vst [vmem:[%s1738_s21 + $0x408] sm:$0xff] %v802_v7  ;;  %v601_v23 = vsub.f32 %v391_v61, %v1698_v11  ;;  %v413_v1 = vld [vmem:[%s1682_s9 + $0x4f0] sm:$0xff]  ;;  %v414_v2 = vld [vmem:[%s1682_s9 + $0x4f8] sm:$0xff] }
  0xcc   : > { %995 = vst [vmem:[%s1738_s21 + $0x410] sm:$0xff] %v803_v10  ;;  %996 = vst [vmem:[%s1738_s21 + $0x418] sm:$0xff] %v804_v13  ;;  %v602_v24 = vsub.f32 %v392_v62, %v1704_v15  ;;  %v603_v25 = vsub.f32 %v393_v3, %v1693_v8  ;;  %v604_v26 = vsub.f32 %v394_v4, %v1698_v11 }
  0xcd   : > { %997 = vst [vmem:[%s1738_s21 + $0x420] sm:$0xff] %v805_v19  ;;  %998 = vst [vmem:[%s1738_s21 + $0x428] sm:$0xff] %v806_v20  ;;  %v605_v29 = vsub.f32 %v395_v5, %v1704_v15  ;;  %v606_v30 = vsub.f32 %v396_v14, %v1693_v8  ;;  %v607_v31 = vsub.f32 %v397_v17, %v1698_v11  ;;  %v415_v17 = vld [vmem:[%s1682_s9 + $0x500] sm:$0xff] }
  0xce   : > { %999 = vst [vmem:[%s1738_s21 + $0x430] sm:$0xff] %v807_v21  ;;  %1000 = vst [vmem:[%s1738_s21 + $0x438] sm:$0xff] %v808_v22  ;;  %v608_v32 = vsub.f32 %v398_v18, %v1704_v15  ;;  %v809_v36 = vmul.f32 %v1700_v12, %v601_v23  ;;  %v810_v37 = vmul.f32 %v1706_v16, %v602_v24  ;;  %v416_v18 = vld [vmem:[%s1682_s9 + $0x508] sm:$0xff]  ;;  %v417_v23 = vld [vmem:[%s1682_s9 + $0x510] sm:$0xff] }
  0xcf   : > { %v811_v38 = vmul.f32 %v1695_v9, %v603_v25  ;;  %v812_v39 = vmul.f32 %v1700_v12, %v604_v26  ;;  %v813_v43 = vmul.f32 %v1706_v16, %v605_v29  ;;  %v814_v44 = vmul.f32 %v1695_v9, %v606_v30  ;;  %v418_v24 = vld [vmem:[%s1682_s9 + $0x518] sm:$0xff]  ;;  %v419_v25 = vld [vmem:[%s1682_s9 + $0x520] sm:$0xff]  ;;  %v420_v30 = vld [vmem:[%s1682_s9 + $0x528] sm:$0xff] }
  0xd0   : > { %v815_v45 = vmul.f32 %v1700_v12, %v607_v31  ;;  %v816_v46 = vmul.f32 %v1706_v16, %v608_v32  ;;  %1001 = vst [vmem:[%s1738_s21 + $0x440] sm:$0xff] %v809_v36  ;;  %1002 = vst [vmem:[%s1738_s21 + $0x448] sm:$0xff] %v810_v37  ;;  %v609_v47 = vsub.f32 %v399_v27, %v1693_v8  ;;  %v421_v31 = vld [vmem:[%s1682_s9 + $0x530] sm:$0xff]  ;;  %v422_v32 = vld [vmem:[%s1682_s9 + $0x538] sm:$0xff] }
  0xd1   : > { %1003 = vst [vmem:[%s1738_s21 + $0x450] sm:$0xff] %v811_v38  ;;  %1004 = vst [vmem:[%s1738_s21 + $0x458] sm:$0xff] %v812_v39  ;;  %v610_v48 = vsub.f32 %v400_v28, %v1698_v11  ;;  %v611_v49 = vsub.f32 %v401_v33, %v1704_v15  ;;  %v612_v50 = vsub.f32 %v402_v34, %v1693_v8 }
  0xd2   : > { %1005 = vst [vmem:[%s1738_s21 + $0x460] sm:$0xff] %v813_v43  ;;  %1006 = vst [vmem:[%s1738_s21 + $0x468] sm:$0xff] %v814_v44  ;;  %v613_v53 = vsub.f32 %v403_v35, %v1698_v11  ;;  %v614_v54 = vsub.f32 %v404_v40, %v1704_v15  ;;  %v615_v55 = vsub.f32 %v405_v41, %v1693_v8  ;;  %v423_v41 = vld [vmem:[%s1682_s9 + $0x540] sm:$0xff] }
  0xd3   : > { %1007 = vst [vmem:[%s1738_s21 + $0x470] sm:$0xff] %v815_v45  ;;  %1008 = vst [vmem:[%s1738_s21 + $0x478] sm:$0xff] %v816_v46  ;;  %v616_v56 = vsub.f32 %v406_v42, %v1698_v11  ;;  %v817_v60 = vmul.f32 %v1695_v9, %v609_v47  ;;  %v818_v61 = vmul.f32 %v1700_v12, %v610_v48  ;;  %v424_v42 = vld [vmem:[%s1682_s9 + $0x548] sm:$0xff]  ;;  %v425_v47 = vld [vmem:[%s1682_s9 + $0x550] sm:$0xff] }
  0xd4   : > { %v819_v62 = vmul.f32 %v1706_v16, %v611_v49  ;;  %v820_v63 = vmul.f32 %v1695_v9, %v612_v50  ;;  %v821_v3 = vmul.f32 %v1700_v12, %v613_v53  ;;  %v822_v4 = vmul.f32 %v1706_v16, %v614_v54  ;;  %v426_v48 = vld [vmem:[%s1682_s9 + $0x558] sm:$0xff]  ;;  %v427_v49 = vld [vmem:[%s1682_s9 + $0x560] sm:$0xff]  ;;  %v428_v54 = vld [vmem:[%s1682_s9 + $0x568] sm:$0xff] }
  0xd5   : > { %v823_v5 = vmul.f32 %v1695_v9, %v615_v55  ;;  %v824_v6 = vmul.f32 %v1700_v12, %v616_v56  ;;  %1009 = vst [vmem:[%s1738_s21 + $0x480] sm:$0xff] %v817_v60  ;;  %1010 = vst [vmem:[%s1738_s21 + $0x488] sm:$0xff] %v818_v61  ;;  %v617_v7 = vsub.f32 %v407_v51, %v1704_v15  ;;  %v429_v55 = vld [vmem:[%s1682_s9 + $0x570] sm:$0xff]  ;;  %v430_v56 = vld [vmem:[%s1682_s9 + $0x578] sm:$0xff] }
  0xd6   : > { %1011 = vst [vmem:[%s1738_s21 + $0x490] sm:$0xff] %v819_v62  ;;  %1012 = vst [vmem:[%s1738_s21 + $0x498] sm:$0xff] %v820_v63  ;;  %v618_v10 = vsub.f32 %v408_v52, %v1693_v8  ;;  %v619_v13 = vsub.f32 %v409_v57, %v1698_v11  ;;  %v620_v14 = vsub.f32 %v410_v58, %v1704_v15 }
  0xd7   : > { %1013 = vst [vmem:[%s1738_s21 + $0x4a0] sm:$0xff] %v821_v3  ;;  %1014 = vst [vmem:[%s1738_s21 + $0x4a8] sm:$0xff] %v822_v4  ;;  %v621_v19 = vsub.f32 %v411_v59, %v1693_v8  ;;  %v622_v20 = vsub.f32 %v412_v0, %v1698_v11  ;;  %v623_v21 = vsub.f32 %v413_v1, %v1704_v15  ;;  %v431_v1 = vld [vmem:[%s1682_s9 + $0x580] sm:$0xff] }
  0xd8   : > { %1015 = vst [vmem:[%s1738_s21 + $0x4b0] sm:$0xff] %v823_v5  ;;  %1016 = vst [vmem:[%s1738_s21 + $0x4b8] sm:$0xff] %v824_v6  ;;  %v624_v22 = vsub.f32 %v414_v2, %v1693_v8  ;;  %v825_v26 = vmul.f32 %v1706_v16, %v617_v7  ;;  %v826_v27 = vmul.f32 %v1695_v9, %v618_v10  ;;  %v432_v2 = vld [vmem:[%s1682_s9 + $0x588] sm:$0xff]  ;;  %v433_v7 = vld [vmem:[%s1682_s9 + $0x590] sm:$0xff] }
  0xd9   : > { %v827_v28 = vmul.f32 %v1700_v12, %v619_v13  ;;  %v828_v29 = vmul.f32 %v1706_v16, %v620_v14  ;;  %v829_v33 = vmul.f32 %v1695_v9, %v621_v19  ;;  %v830_v34 = vmul.f32 %v1700_v12, %v622_v20  ;;  %v434_v10 = vld [vmem:[%s1682_s9 + $0x598] sm:$0xff]  ;;  %v435_v13 = vld [vmem:[%s1682_s9 + $0x5a0] sm:$0xff]  ;;  %v436_v20 = vld [vmem:[%s1682_s9 + $0x5a8] sm:$0xff] }
  0xda   : > { %v831_v35 = vmul.f32 %v1706_v16, %v623_v21  ;;  %v832_v36 = vmul.f32 %v1695_v9, %v624_v22  ;;  %1017 = vst [vmem:[%s1738_s21 + $0x4c0] sm:$0xff] %v825_v26  ;;  %1018 = vst [vmem:[%s1738_s21 + $0x4c8] sm:$0xff] %v826_v27  ;;  %v625_v37 = vsub.f32 %v415_v17, %v1698_v11  ;;  %v437_v21 = vld [vmem:[%s1682_s9 + $0x5b0] sm:$0xff]  ;;  %v438_v22 = vld [vmem:[%s1682_s9 + $0x5b8] sm:$0xff] }
  0xdb   : > { %1019 = vst [vmem:[%s1738_s21 + $0x4d0] sm:$0xff] %v827_v28  ;;  %1020 = vst [vmem:[%s1738_s21 + $0x4d8] sm:$0xff] %v828_v29  ;;  %v626_v38 = vsub.f32 %v416_v18, %v1704_v15  ;;  %v627_v39 = vsub.f32 %v417_v23, %v1693_v8  ;;  %v628_v40 = vsub.f32 %v418_v24, %v1698_v11 }
  0xdc   : > { %1021 = vst [vmem:[%s1738_s21 + $0x4e0] sm:$0xff] %v829_v33  ;;  %1022 = vst [vmem:[%s1738_s21 + $0x4e8] sm:$0xff] %v830_v34  ;;  %v629_v43 = vsub.f32 %v419_v25, %v1704_v15  ;;  %v630_v44 = vsub.f32 %v420_v30, %v1693_v8  ;;  %v631_v45 = vsub.f32 %v421_v31, %v1698_v11  ;;  %v439_v31 = vld [vmem:[%s1682_s9 + $0x5c0] sm:$0xff] }
  0xdd   : > { %1023 = vst [vmem:[%s1738_s21 + $0x4f0] sm:$0xff] %v831_v35  ;;  %1024 = vst [vmem:[%s1738_s21 + $0x4f8] sm:$0xff] %v832_v36  ;;  %v632_v46 = vsub.f32 %v422_v32, %v1704_v15  ;;  %v833_v50 = vmul.f32 %v1700_v12, %v625_v37  ;;  %v834_v51 = vmul.f32 %v1706_v16, %v626_v38  ;;  %v440_v32 = vld [vmem:[%s1682_s9 + $0x5c8] sm:$0xff]  ;;  %v441_v37 = vld [vmem:[%s1682_s9 + $0x5d0] sm:$0xff] }
  0xde   : > { %v835_v52 = vmul.f32 %v1695_v9, %v627_v39  ;;  %v836_v53 = vmul.f32 %v1700_v12, %v628_v40  ;;  %v837_v57 = vmul.f32 %v1706_v16, %v629_v43  ;;  %v838_v58 = vmul.f32 %v1695_v9, %v630_v44  ;;  %v442_v38 = vld [vmem:[%s1682_s9 + $0x5d8] sm:$0xff]  ;;  %v443_v39 = vld [vmem:[%s1682_s9 + $0x5e0] sm:$0xff]  ;;  %v444_v44 = vld [vmem:[%s1682_s9 + $0x5e8] sm:$0xff] }
  0xdf   : > { %v839_v59 = vmul.f32 %v1700_v12, %v631_v45  ;;  %v840_v60 = vmul.f32 %v1706_v16, %v632_v46  ;;  %1025 = vst [vmem:[%s1738_s21 + $0x500] sm:$0xff] %v833_v50  ;;  %1026 = vst [vmem:[%s1738_s21 + $0x508] sm:$0xff] %v834_v51  ;;  %v633_v61 = vsub.f32 %v423_v41, %v1693_v8  ;;  %v445_v45 = vld [vmem:[%s1682_s9 + $0x5f0] sm:$0xff]  ;;  %v446_v46 = vld [vmem:[%s1682_s9 + $0x5f8] sm:$0xff] }
  0xe0   : > { %1027 = vst [vmem:[%s1738_s21 + $0x510] sm:$0xff] %v835_v52  ;;  %1028 = vst [vmem:[%s1738_s21 + $0x518] sm:$0xff] %v836_v53  ;;  %v634_v62 = vsub.f32 %v424_v42, %v1698_v11  ;;  %v635_v63 = vsub.f32 %v425_v47, %v1704_v15  ;;  %v636_v0 = vsub.f32 %v426_v48, %v1693_v8 }
  0xe1   : > { %1029 = vst [vmem:[%s1738_s21 + $0x520] sm:$0xff] %v837_v57  ;;  %1030 = vst [vmem:[%s1738_s21 + $0x528] sm:$0xff] %v838_v58  ;;  %v637_v3 = vsub.f32 %v427_v49, %v1698_v11  ;;  %v638_v4 = vsub.f32 %v428_v54, %v1704_v15  ;;  %v639_v5 = vsub.f32 %v429_v55, %v1693_v8 }
  0xe2   : > { %1031 = vst [vmem:[%s1738_s21 + $0x530] sm:$0xff] %v839_v59  ;;  %1032 = vst [vmem:[%s1738_s21 + $0x538] sm:$0xff] %v840_v60  ;;  %v640_v6 = vsub.f32 %v430_v56, %v1698_v11  ;;  %v841_v14 = vmul.f32 %v1695_v9, %v633_v61  ;;  %v842_v17 = vmul.f32 %v1700_v12, %v634_v62 }
  0xe3   : > { %v843_v18 = vmul.f32 %v1706_v16, %v635_v63  ;;  %v844_v19 = vmul.f32 %v1695_v9, %v636_v0  ;;  %v845_v23 = vmul.f32 %v1700_v12, %v637_v3  ;;  %v846_v24 = vmul.f32 %v1706_v16, %v638_v4 }
  0xe4   : > { %v847_v25 = vmul.f32 %v1695_v9, %v639_v5  ;;  %v848_v26 = vmul.f32 %v1700_v12, %v640_v6  ;;  %1033 = vst [vmem:[%s1738_s21 + $0x540] sm:$0xff] %v841_v14  ;;  %1034 = vst [vmem:[%s1738_s21 + $0x548] sm:$0xff] %v842_v17  ;;  %v641_v27 = vsub.f32 %v431_v1, %v1704_v15 }
  0xe5   : > { %1035 = vst [vmem:[%s1738_s21 + $0x550] sm:$0xff] %v843_v18  ;;  %1036 = vst [vmem:[%s1738_s21 + $0x558] sm:$0xff] %v844_v19  ;;  %v642_v28 = vsub.f32 %v432_v2, %v1693_v8  ;;  %v643_v29 = vsub.f32 %v433_v7, %v1698_v11  ;;  %v644_v30 = vsub.f32 %v434_v10, %v1704_v15 }
  0xe6   : > { %1037 = vst [vmem:[%s1738_s21 + $0x560] sm:$0xff] %v845_v23  ;;  %1038 = vst [vmem:[%s1738_s21 + $0x568] sm:$0xff] %v846_v24  ;;  %v645_v33 = vsub.f32 %v435_v13, %v1693_v8  ;;  %v646_v34 = vsub.f32 %v436_v20, %v1698_v11  ;;  %v647_v35 = vsub.f32 %v437_v21, %v1704_v15 }
  0xe7   : > { %1039 = vst [vmem:[%s1738_s21 + $0x570] sm:$0xff] %v847_v25  ;;  %1040 = vst [vmem:[%s1738_s21 + $0x578] sm:$0xff] %v848_v26  ;;  %v648_v36 = vsub.f32 %v438_v22, %v1693_v8  ;;  %v849_v40 = vmul.f32 %v1706_v16, %v641_v27  ;;  %v850_v41 = vmul.f32 %v1695_v9, %v642_v28 }
  0xe8   : > { %v851_v42 = vmul.f32 %v1700_v12, %v643_v29  ;;  %v852_v43 = vmul.f32 %v1706_v16, %v644_v30  ;;  %v853_v47 = vmul.f32 %v1695_v9, %v645_v33  ;;  %v854_v48 = vmul.f32 %v1700_v12, %v646_v34 }
  0xe9   : > { %v855_v49 = vmul.f32 %v1706_v16, %v647_v35  ;;  %v856_v50 = vmul.f32 %v1695_v9, %v648_v36  ;;  %1041 = vst [vmem:[%s1738_s21 + $0x580] sm:$0xff] %v849_v40  ;;  %1042 = vst [vmem:[%s1738_s21 + $0x588] sm:$0xff] %v850_v41  ;;  %v649_v51 = vsub.f32 %v439_v31, %v1698_v11 }
  0xea   : > { %1043 = vst [vmem:[%s1738_s21 + $0x590] sm:$0xff] %v851_v42  ;;  %1044 = vst [vmem:[%s1738_s21 + $0x598] sm:$0xff] %v852_v43  ;;  %v650_v52 = vsub.f32 %v440_v32, %v1704_v15  ;;  %v651_v53 = vsub.f32 %v441_v37, %v1693_v8  ;;  %v652_v54 = vsub.f32 %v442_v38, %v1698_v11 }
  0xeb   : > { %1045 = vst [vmem:[%s1738_s21 + $0x5a0] sm:$0xff] %v853_v47  ;;  %1046 = vst [vmem:[%s1738_s21 + $0x5a8] sm:$0xff] %v854_v48  ;;  %v653_v55 = vsub.f32 %v443_v39, %v1704_v15  ;;  %v654_v56 = vsub.f32 %v444_v44, %v1693_v8  ;;  %v655_v57 = vsub.f32 %v445_v45, %v1698_v11 }
  0xec   : > { %1047 = vst [vmem:[%s1738_s21 + $0x5b0] sm:$0xff] %v855_v49  ;;  %1048 = vst [vmem:[%s1738_s21 + $0x5b8] sm:$0xff] %v856_v50  ;;  %v656_v58 = vsub.f32 %v446_v46, %v1704_v15  ;;  %v857_v59 = vmul.f32 %v1700_v12, %v649_v51  ;;  %v858_v60 = vmul.f32 %v1706_v16, %v650_v52 }
  0xed   : > { %v859_v61 = vmul.f32 %v1695_v9, %v651_v53  ;;  %v860_v62 = vmul.f32 %v1700_v12, %v652_v54  ;;  %v861_v8 = vmul.f32 %v1706_v16, %v653_v55  ;;  %v862_v11 = vmul.f32 %v1695_v9, %v654_v56 }
  0xee   : > { %v863_v15 = vmul.f32 %v1700_v12, %v655_v57  ;;  %v864_v63 = vmul.f32 %v1706_v16, %v656_v58  ;;  %1049 = vst [vmem:[%s1738_s21 + $0x5c0] sm:$0xff] %v857_v59  ;;  %1050 = vst [vmem:[%s1738_s21 + $0x5c8] sm:$0xff] %v858_v60 }
  0xef   : > { %1051 = vst [vmem:[%s1738_s21 + $0x5d0] sm:$0xff] %v859_v61  ;;  %1052 = vst [vmem:[%s1738_s21 + $0x5d8] sm:$0xff] %v860_v62 }
  0xf0   : > { %1053 = vst [vmem:[%s1738_s21 + $0x5e0] sm:$0xff] %v861_v8  ;;  %1054 = vst [vmem:[%s1738_s21 + $0x5e8] sm:$0xff] %v862_v11 }
  0xf1   : > { %1055 = vst [vmem:[%s1738_s21 + $0x5f0] sm:$0xff] %v863_v15  ;;  %1056 = vst [vmem:[%s1738_s21 + $0x5f8] sm:$0xff] %v864_v63 }
  0xf2   : > { %1391 = shalt.err (!%p1388_p2)
}
  0xf3   : > { %s1392_s18 = scalar_lea.hbm %s2475_s10, 24576  ;;  %s1396_s5 = scalar_lea.hbm %s2535_s3, 49152 }
  0xf4   : > { %p1393_p8 = scmp.ne.s32.totalorder %s2475_s10, %s1392_s18  ;;  %p1397_p7 = scmp.lt.u32.totalorder %s2475_s10, %s2535_s3 }
  0xf5   : > { %p1398_p12 = scmp.lt.u32.totalorder %s1396_s5, %s1392_s18  ;;  %p1400_p5 = scmp.lt.u32.totalorder %s1392_s18, %s2475_s10 }
  0xf6   : > { %p1394_p13 = pnand %p1393_p8, %p2554_p10 }
  0xf7   : > { %p1399_p3 = por %p1398_p12, %p1397_p7 }
  0xf8   : > { %p1395_p4 = pneg %p1394_p13 }
  0xf9   : > { %p1401_p11 = por %p1400_p5, %p1399_p3 }
  0xfb   : > { %p1402_p1 = pnand %p1401_p11, %p1395_p4 }
  0xfd   : > { %1405 = shalt.err (!%p1402_p1)
}
  0xfe   : > { %s1472_s21 = smov 384   ;;  %s1473_s23 = smov 24  }
  0xff   : > { %1215 = dma.vmem_to_hbm [thread:$0]  (%p2554_p10), %s2466_s26, 24576, %s2475_s10, %s1058_s28, %s1472_s21, %s1472_s21, %s1473_s23  }
 0x100 PF: > { %s1089_s15 = sand.u32 1, %s1444_s12   ;;  %p2555_p0 = scmp.ne.s32.totalorder %s2546_s25, 0 }
 0x101   : > { %p2556_p6 = scmp.ge.s32.totalorder %s1464_s17, 2  ;;  %s1090_s29 = scalar_lea.sflag [#allocation4], %s1089_s15 }
 0x103   : > { %p1229_p9 = pnand %p2556_p6, %p2555_p0 }
 0x105   : > { %1439 = dma.done.wait (!%p1229_p9), %s1090_s29, 24576  }
 0x106   : > { %1441 = vsyncadd (!%p1229_p9), %s1090_s29, 4294942720  ;;  %s20_s17 = sadd.s32 1, %s1464_s17   ;;  %s2557_s12 = smov %s1448_s13 }
 0x107   : > { %p17_p2 = scmp.ge.s32.totalorder %s20_s17, 4   ;;  %s2558_s13 = smov %s1452_s14 }
 0x108   : > { %s2559_s14 = smov %s1643_s4  ;;  %s2560_s15 = smov %s1460_s16 }
 0x109   : > { %s2561_s16 = smov %s2563_s30  ;;  %19 = sbr.rel (!%p17_p2) target bundleno = 7 (0x7), region = 87 }
 0x110   :  { %1095 = vsyncpa [#allocation3], 1 }
 0x111   :  { %1097 = vsyncpa [#allocation3 + $0x1], 1 }
 0x112   :  { %1098 = vsyncpa [#allocation6], 1 }
 0x113   :  { %1099 = vsyncpa [#allocation4], 1 }
 0x114   :  { %1101 = vsyncpa [#allocation4 + $0x1], 1 }

</bundles_post_ra>
